<compile_context>
chip_gen: v5e
topology: v5e:2x2
jax: 0.10.0
libtpu: 0.0.40
codegen_flags: <defaults>
</compile_context>

<pallas_src>
import jax
import jax.numpy as jnp
from jax import lax
from jax.experimental import pallas as pl
from jax.experimental.pallas import tpu as pltpu


def _round_up(n, m):
    return ((n + m - 1) // m) * m


def lnet_kernel(x_ref, w_h_ref, b_h_ref, w_out_ref, b_out_ref, o_ref):
    # x_ref:     (TB, D)   f32   (one batch tile)
    # w_h_ref:   (4, D, D) bf16  (transposed hidden weights, resident)
    # b_h_ref:   (4, 1, D) f32   (hidden biases, resident)
    # w_out_ref: (1, D)    bf16  (output-head weight, PyTorch layout)
    # b_out_ref: (1, 1)    f32
    # o_ref:     (1, 1, TB) f32  (lane-dense per-tile output row)
    h = x_ref[...]                                        # (TB, D) f32

    # Four hidden layers: y = relu(h @ W_t + b).
    # MXU gets bf16 operands, accumulation stays f32; bias-add / ReLU in f32
    # (v5e VPU has no bf16 path).  Static Python loop -> fully unrolled.
    for k in range(4):
        w = w_h_ref[k]                                    # (D, D) bf16
        b = b_h_ref[k]                                    # (1, D) f32
        z = jnp.dot(h.astype(jnp.bfloat16), w,
                    preferred_element_type=jnp.float32) + b
        h = jnp.maximum(z, 0.0)

    # Output head (D -> 1), computed lane-dense:
    #   (1, D) . (TB, D)^T  ->  (1, TB)
    # so the store below is a full-lane unmasked write instead of TB masked
    # single-lane column stores.
    z = lax.dot_general(
        w_out_ref[...], h.astype(jnp.bfloat16),
        dimension_numbers=(((1,), (1,)), ((), ())),
        preferred_element_type=jnp.float32)               # (1, TB)
    z = z + b_out_ref[...]                                # (1,1) broadcast
    o_ref[...] = jax.nn.sigmoid(z)[None]                  # (1, 1, TB)


def lnet_forward(x, params, tile_b=512):
    """x: (B, D) float32. params: packed dict from init_params. Returns (B, 1)."""
    B, D = x.shape

    # Batch tile: multiple of 128 (lane-dense output + sublane alignment).
    TB = min(_round_up(tile_b, 128), _round_up(B, 128))
    Bp = _round_up(B, TB)
    if Bp != B:
        x = jnp.pad(x, ((0, Bp - B), (0, 0)))             # zero rows, sliced off below
    num_tiles = Bp // TB

    w_h = params["w_hidden"]      # (4, D, D) bf16
    b_h = params["b_hidden"]      # (4, 1, D) f32
    w_o = params["w_out_row"]     # (1, D)    bf16
    b_o = params["b_out"]         # (1, 1)    f32

    out = pl.pallas_call(
        lnet_kernel,
        out_shape=jax.ShapeDtypeStruct((num_tiles, 1, TB), jnp.float32),
        grid=(num_tiles,),
        in_specs=[
            pl.BlockSpec((TB, D), lambda i: (i, 0)),          # streamed batch tile
            pl.BlockSpec(w_h.shape, lambda i: (0, 0, 0)),     # resident weights
            pl.BlockSpec(b_h.shape, lambda i: (0, 0, 0)),     # resident biases
            pl.BlockSpec(w_o.shape, lambda i: (0, 0)),
            pl.BlockSpec(b_o.shape, lambda i: (0, 0)),
        ],
        out_specs=pl.BlockSpec((1, 1, TB), lambda i: (i, 0, 0)),
        compiler_params=pltpu.CompilerParams(
            dimension_semantics=("parallel",)),               # batch tiles independent
    )(x, w_h, b_h, w_o, b_o)

    # (num_tiles, 1, TB) row-major == batch order -> (Bp, 1), drop padding.
    return out.reshape(Bp, 1)[:B]


def init_params(key, d):
    """PyTorch nn.Linear default init (U[-1/sqrt(in), 1/sqrt(in)]), packed.

    Hidden weights are stored transposed as (in, out) and stacked: (4, d, d),
    cast to bf16 (MXU operands).  Biases stay f32."""
    bound = 1.0 / float(d) ** 0.5
    keys = jax.random.split(key, 10)

    ws, bs = [], []
    for k in range(4):
        ws.append(jax.random.uniform(keys[2 * k], (d, d), jnp.float32, -bound, bound))
        bs.append(jax.random.uniform(keys[2 * k + 1], (1, d), jnp.float32, -bound, bound))
    w_out_row = jax.random.uniform(keys[8], (1, d), jnp.float32, -bound, bound)
    b_out = jax.random.uniform(keys[9], (1, 1), jnp.float32, -bound, bound)

    return dict(
        w_hidden=jnp.stack(ws).astype(jnp.bfloat16),   # (4, d, d)
        b_hidden=jnp.stack(bs),                        # (4, 1, d)
        w_out_row=w_out_row.astype(jnp.bfloat16),      # (1, d)
        b_out=b_out,                                   # (1, 1)
    )


def lnet_reference(x, p):
    """Pure-JAX reference of the eval-mode forward (same bf16-operand /
    f32-accumulate precision chain as the kernel)."""
    h = x
    for k in range(4):
        z = jnp.dot(h.astype(jnp.bfloat16), p["w_hidden"][k],
                    preferred_element_type=jnp.float32) + p["b_hidden"][k]
        h = jnp.maximum(z, 0.0)
    z = jnp.dot(h.astype(jnp.bfloat16), p["w_out_row"].T,
                preferred_element_type=jnp.float32) + p["b_out"]
    return jax.nn.sigmoid(z)


# TODO(synk): train-mode AlphaDropout (stochastic affine noise) is not
# implemented; this kernel is the inference forward where it is identity.

if __name__ == "__main__":
    B, X_size = 1000, 32            # exercises multi-tile grid + batch padding
    key = jax.random.PRNGKey(0)
    k_x, k_p = jax.random.split(key)

    x = jax.random.normal(k_x, (B, X_size), dtype=jnp.float32)
    params = init_params(k_p, X_size)

    fwd = jax.jit(lambda xx: lnet_forward(xx, params, tile_b=512))
    out = jax.block_until_ready(fwd(x))

    ref = lnet_reference(x, params)
    assert out.shape == (B, 1)
    assert jnp.allclose(out, ref, atol=1e-4, rtol=1e-4), "mismatch vs reference"

    print("KERNEL_OK")
</pallas_src>

<mosaic_0001>
module attributes {stable_mosaic.version = 11 : i64} {
  func.func @lnet_kernel(%arg0: i32, %arg1: memref<512x32xf32, #tpu.memory_space<vmem>>, %arg2: memref<4x32x32xbf16, #tpu.memory_space<vmem>>, %arg3: memref<4x1x32xf32, #tpu.memory_space<vmem>>, %arg4: memref<1x32xbf16, #tpu.memory_space<vmem>>, %arg5: memref<1x1xf32, #tpu.memory_space<vmem>>, %arg6: memref<1x1x512xf32, #tpu.memory_space<vmem>>) attributes {dimension_semantics = [#tpu.dimension_semantics<parallel>], iteration_bounds = array<i64: 2>, scalar_prefetch = 0 : i64, scratch_operands = 0 : i64, tpu.core_type = #tpu.core_type<tc>, window_params = [{transform_indices = @transform_0, window_bounds = array<i64: 512, 32>}, {pipeline_mode = #tpu.pipeline_mode<synchronous>, transform_indices = @transform_1, window_bounds = array<i64: 4, 32, 32>}, {pipeline_mode = #tpu.pipeline_mode<synchronous>, transform_indices = @transform_2, window_bounds = array<i64: 4, 1, 32>}, {pipeline_mode = #tpu.pipeline_mode<synchronous>, transform_indices = @transform_3, window_bounds = array<i64: 1, 32>}, {pipeline_mode = #tpu.pipeline_mode<synchronous>, transform_indices = @transform_4, window_bounds = array<i64: 1, 1>}, {transform_indices = @transform_5, window_bounds = array<i64: 1, 1, 512>}]} {
    %c0 = arith.constant 0 : index
    %c0_0 = arith.constant 0 : index
    %0 = vector.load %arg1[%c0, %c0_0] : memref<512x32xf32, #tpu.memory_space<vmem>>, vector<512x32xf32>
    %c0_1 = arith.constant 0 : index
    %c0_2 = arith.constant 0 : index
    %c0_3 = arith.constant 0 : index
    %1 = vector.load %arg2[%c0_1, %c0_2, %c0_3] : memref<4x32x32xbf16, #tpu.memory_space<vmem>>, vector<1x32x32xbf16>
    %2 = vector.shape_cast %1 : vector<1x32x32xbf16> to vector<32x32xbf16>
    %c0_4 = arith.constant 0 : index
    %c0_5 = arith.constant 0 : index
    %c0_6 = arith.constant 0 : index
    %3 = vector.load %arg3[%c0_4, %c0_5, %c0_6] : memref<4x1x32xf32, #tpu.memory_space<vmem>>, vector<1x1x32xf32>
    %4 = vector.shape_cast %3 : vector<1x1x32xf32> to vector<1x32xf32>
    %5 = arith.truncf %0 : vector<512x32xf32> to vector<512x32xbf16>
    %cst = arith.constant dense<0.000000e+00> : vector<512x32xf32>
    %6 = tpu.matmul %5, %2, %cst {dimension_numbers = #tpu.dot_dimension_numbers<[1], [0], [0], [1], [0, 0, 1, 1], [], []>} : vector<512x32xbf16>, vector<32x32xbf16>, vector<512x32xf32> -> vector<512x32xf32>
    %7 = vector.broadcast %4 : vector<1x32xf32> to vector<512x32xf32>
    %8 = arith.addf %6, %7 : vector<512x32xf32>
    %cst_7 = arith.constant 0.000000e+00 : f32
    %9 = vector.broadcast %cst_7 : f32 to vector<512x32xf32>
    %10 = arith.maximumf %8, %9 : vector<512x32xf32>
    %c1 = arith.constant 1 : index
    %c0_8 = arith.constant 0 : index
    %c0_9 = arith.constant 0 : index
    %11 = vector.load %arg2[%c1, %c0_8, %c0_9] : memref<4x32x32xbf16, #tpu.memory_space<vmem>>, vector<1x32x32xbf16>
    %12 = vector.shape_cast %11 : vector<1x32x32xbf16> to vector<32x32xbf16>
    %c1_10 = arith.constant 1 : index
    %c0_11 = arith.constant 0 : index
    %c0_12 = arith.constant 0 : index
    %13 = vector.load %arg3[%c1_10, %c0_11, %c0_12] : memref<4x1x32xf32, #tpu.memory_space<vmem>>, vector<1x1x32xf32>
    %14 = vector.shape_cast %13 : vector<1x1x32xf32> to vector<1x32xf32>
    %15 = arith.truncf %10 : vector<512x32xf32> to vector<512x32xbf16>
    %cst_13 = arith.constant dense<0.000000e+00> : vector<512x32xf32>
    %16 = tpu.matmul %15, %12, %cst_13 {dimension_numbers = #tpu.dot_dimension_numbers<[1], [0], [0], [1], [0, 0, 1, 1], [], []>} : vector<512x32xbf16>, vector<32x32xbf16>, vector<512x32xf32> -> vector<512x32xf32>
    %17 = vector.broadcast %14 : vector<1x32xf32> to vector<512x32xf32>
    %18 = arith.addf %16, %17 : vector<512x32xf32>
    %cst_14 = arith.constant 0.000000e+00 : f32
    %19 = vector.broadcast %cst_14 : f32 to vector<512x32xf32>
    %20 = arith.maximumf %18, %19 : vector<512x32xf32>
    %c2 = arith.constant 2 : index
    %c0_15 = arith.constant 0 : index
    %c0_16 = arith.constant 0 : index
    %21 = vector.load %arg2[%c2, %c0_15, %c0_16] : memref<4x32x32xbf16, #tpu.memory_space<vmem>>, vector<1x32x32xbf16>
    %22 = vector.shape_cast %21 : vector<1x32x32xbf16> to vector<32x32xbf16>
    %c2_17 = arith.constant 2 : index
    %c0_18 = arith.constant 0 : index
    %c0_19 = arith.constant 0 : index
    %23 = vector.load %arg3[%c2_17, %c0_18, %c0_19] : memref<4x1x32xf32, #tpu.memory_space<vmem>>, vector<1x1x32xf32>
    %24 = vector.shape_cast %23 : vector<1x1x32xf32> to vector<1x32xf32>
    %25 = arith.truncf %20 : vector<512x32xf32> to vector<512x32xbf16>
    %cst_20 = arith.constant dense<0.000000e+00> : vector<512x32xf32>
    %26 = tpu.matmul %25, %22, %cst_20 {dimension_numbers = #tpu.dot_dimension_numbers<[1], [0], [0], [1], [0, 0, 1, 1], [], []>} : vector<512x32xbf16>, vector<32x32xbf16>, vector<512x32xf32> -> vector<512x32xf32>
    %27 = vector.broadcast %24 : vector<1x32xf32> to vector<512x32xf32>
    %28 = arith.addf %26, %27 : vector<512x32xf32>
    %cst_21 = arith.constant 0.000000e+00 : f32
    %29 = vector.broadcast %cst_21 : f32 to vector<512x32xf32>
    %30 = arith.maximumf %28, %29 : vector<512x32xf32>
    %c3 = arith.constant 3 : index
    %c0_22 = arith.constant 0 : index
    %c0_23 = arith.constant 0 : index
    %31 = vector.load %arg2[%c3, %c0_22, %c0_23] : memref<4x32x32xbf16, #tpu.memory_space<vmem>>, vector<1x32x32xbf16>
    %32 = vector.shape_cast %31 : vector<1x32x32xbf16> to vector<32x32xbf16>
    %c3_24 = arith.constant 3 : index
    %c0_25 = arith.constant 0 : index
    %c0_26 = arith.constant 0 : index
    %33 = vector.load %arg3[%c3_24, %c0_25, %c0_26] : memref<4x1x32xf32, #tpu.memory_space<vmem>>, vector<1x1x32xf32>
    %34 = vector.shape_cast %33 : vector<1x1x32xf32> to vector<1x32xf32>
    %35 = arith.truncf %30 : vector<512x32xf32> to vector<512x32xbf16>
    %cst_27 = arith.constant dense<0.000000e+00> : vector<512x32xf32>
    %36 = tpu.matmul %35, %32, %cst_27 {dimension_numbers = #tpu.dot_dimension_numbers<[1], [0], [0], [1], [0, 0, 1, 1], [], []>} : vector<512x32xbf16>, vector<32x32xbf16>, vector<512x32xf32> -> vector<512x32xf32>
    %37 = vector.broadcast %34 : vector<1x32xf32> to vector<512x32xf32>
    %38 = arith.addf %36, %37 : vector<512x32xf32>
    %cst_28 = arith.constant 0.000000e+00 : f32
    %39 = vector.broadcast %cst_28 : f32 to vector<512x32xf32>
    %40 = arith.maximumf %38, %39 : vector<512x32xf32>
    %c0_29 = arith.constant 0 : index
    %c0_30 = arith.constant 0 : index
    %41 = vector.load %arg4[%c0_29, %c0_30] : memref<1x32xbf16, #tpu.memory_space<vmem>>, vector<1x32xbf16>
    %42 = arith.truncf %40 : vector<512x32xf32> to vector<512x32xbf16>
    %cst_31 = arith.constant dense<0.000000e+00> : vector<1x512xf32>
    %43 = tpu.matmul %41, %42, %cst_31 {dimension_numbers = #tpu.dot_dimension_numbers<[1], [1], [0], [0], [0, 0, 1, 0], [], []>} : vector<1x32xbf16>, vector<512x32xbf16>, vector<1x512xf32> -> vector<1x512xf32>
    %c0_32 = arith.constant 0 : index
    %c0_33 = arith.constant 0 : index
    %44 = vector.load %arg5[%c0_32, %c0_33] : memref<1x1xf32, #tpu.memory_space<vmem>>, vector<1x1xf32>
    %45 = vector.broadcast %44 : vector<1x1xf32> to vector<1x512xf32>
    %46 = arith.addf %43, %45 : vector<1x512xf32>
    %47 = arith.negf %46 : vector<1x512xf32>
    %48 = math.exp %47 : vector<1x512xf32>
    %cst_34 = arith.constant 1.000000e+00 : f32
    %49 = vector.broadcast %cst_34 : f32 to vector<1x512xf32>
    %50 = arith.addf %49, %48 : vector<1x512xf32>
    %51 = arith.divf %49, %50 : vector<1x512xf32>
    %52 = vector.shape_cast %51 : vector<1x512xf32> to vector<1x1x512xf32>
    %c0_35 = arith.constant 0 : index
    %c0_36 = arith.constant 0 : index
    %c0_37 = arith.constant 0 : index
    %53 = vector.load %arg6[%c0_35, %c0_36, %c0_37] : memref<1x1x512xf32, #tpu.memory_space<vmem>>, vector<1x1x512xf32>
    tpu.vector_store %arg6[%c0_35, %c0_36, %c0_37], %52 {strides = array<i32>} : memref<1x1x512xf32, #tpu.memory_space<vmem>>, vector<1x1x512xf32>,
    return
  }
  func.func @transform_0(%arg0: i32) -> (i32, i32) {
    %c0_i32 = arith.constant 0 : i32
    %c0_i32_0 = arith.constant 0 : i32
    return %arg0, %c0_i32 : i32, i32
  }
  func.func @transform_1(%arg0: i32) -> (i32, i32, i32) {
    %c0_i32 = arith.constant 0 : i32
    %c0_i32_0 = arith.constant 0 : i32
    %c0_i32_1 = arith.constant 0 : i32
    %c0_i32_2 = arith.constant 0 : i32
    return %c0_i32, %c0_i32_0, %c0_i32_1 : i32, i32, i32
  }
  func.func @transform_2(%arg0: i32) -> (i32, i32, i32) {
    %c0_i32 = arith.constant 0 : i32
    %c0_i32_0 = arith.constant 0 : i32
    %c0_i32_1 = arith.constant 0 : i32
    %c0_i32_2 = arith.constant 0 : i32
    return %c0_i32, %c0_i32_0, %c0_i32_1 : i32, i32, i32
  }
  func.func @transform_3(%arg0: i32) -> (i32, i32) {
    %c0_i32 = arith.constant 0 : i32
    %c0_i32_0 = arith.constant 0 : i32
    %c0_i32_1 = arith.constant 0 : i32
    return %c0_i32, %c0_i32_0 : i32, i32
  }
  func.func @transform_4(%arg0: i32) -> (i32, i32) {
    %c0_i32 = arith.constant 0 : i32
    %c0_i32_0 = arith.constant 0 : i32
    %c0_i32_1 = arith.constant 0 : i32
    return %c0_i32, %c0_i32_0 : i32, i32
  }
  func.func @transform_5(%arg0: i32) -> (i32, i32, i32) {
    %c0_i32 = arith.constant 0 : i32
    %c0_i32_0 = arith.constant 0 : i32
    %c0_i32_1 = arith.constant 0 : i32
    return %arg0, %c0_i32, %c0_i32_0 : i32, i32, i32
  }
}

</mosaic_0001>

<bundles_post_ra>
// kernel: _lambda_.1
= control target key start
LH: loop header
LB: loop body
LE: loop exit
PB: predicated region body
PF: predicated region fallthrough
CT: control target
= control target key end

     0   :  { %s3269_s0 = inlined_call_operand.vmem [shape: f32[1024,32], index: 0, kind: input, shape index: {}]   ;;  %s3270_s1 = inlined_call_operand.vmem [shape: bf16[4,32,32], index: 1, kind: input, shape index: {}]   ;;  %s3271_s2 = inlined_call_operand.vmem [shape: f32[4,1,32], index: 2, kind: input, shape index: {}]   ;;  %s3272_s3 = inlined_call_operand.vmem [shape: bf16[1,32], index: 3, kind: input, shape index: {}]   ;;  %s3273_s4 = inlined_call_operand.<no memory space> [shape: f32[1,1], index: 4, kind: input, shape index: {}]   ;;  %s3274_s5 = inlined_call_operand.hbm [shape: f32[2,1,512], index: 5, kind: output, shape index: {}]  }
   0x1   :  { %v10_v0 = vstv %s3273_s4 }
   0x2   :  { %11 = vst [vmem:[#allocation2] sm:$0x1] %v10_v0 }
   0x3   :  { %12 = vsyncpa [#allocation4], 0 }
   0x4   :  { %14 = vsyncpa [#allocation4 + $0x1], 0  ;;  %s2549_s20 = smov 0   ;;  %s2551_s21 = smov 0  }
   0x5   :  { %s2553_s22 = smov 0   ;;  %s2555_s23 = smov 0  }
   0x6 LB: > { %s2570_s4 = sadd.s32 4294967295, %s2513_s23   ;;  %s2184_s24 = sadd.s32 4294967294, %s2513_s23   ;;  %s2513_s23 = sphi %s2555_s23, %s3286_s23   ;;  %s2509_s22 = sphi %s2553_s22, %s3285_s22   ;;  %s2505_s21 = sphi %s2551_s21, %s3284_s21   ;;  %s2501_s20 = sphi %s2549_s20, %s3283_s20  }
   0x7   : > { %s2574_s25 = sadd.s32 1, %s2513_s23   ;;  %s137_s26 = sadd.s32 1, %s2509_s22 }
   0x8   : > { %s134_s27 = ssub.s32 %s2513_s23, %s2574_s25  ;;  %p147_p0 = scmp.ne.s32.totalorder %s2509_s22, %s2505_s21 }
   0x9   : > { %p135_p1 = scmp.eq.s32.totalorder %s134_s27, 0  ;;  %p148_p2 = scmp.eq.s32.totalorder %s2570_s4, 1 }
   0xa   : > { %p153_p3 = scmp.ne.s32.totalorder %s2505_s21, %s2501_s20  ;;  %p154_p4 = scmp.eq.s32.totalorder %s2184_s24, 1 }
   0xb   : > { %s2585_s28 = scalar_select %p135_p1, %s2509_s22, %s137_s26  }
   0xc   : > { %p2587_p5 = por %p148_p2, %p147_p0  ;;  %p2591_p6 = por %p154_p4, %p153_p3 }
   0xd   : > { %p2187_p7 = scmp.ge.s32.totalorder %s2513_s23, 1  ;;  %p193_p8 = scmp.lt.s32.totalorder %s2513_s23, 3 }
   0xf   : > { %p194_p9 = pnand %p2187_p7, %p193_p8 }
  0x10   : > { %s2189_s8 = sshll.u32 (!%p194_p9), %s2570_s4, 6  ;;  %s2375_s13 = sshll.u32 (!%p194_p9), %s2570_s4, 2 }
  0x11   : > { %197 = sbr.rel (%p194_p9) target bundleno = 1331 (0x533), region = 40  ;;  %p222_p10 = scmp.lt.s32.totalorder (!%p194_p9), %s2189_s8, 127 }
  0x12   : > { %s2471_s7 = scalar_lea.hbm (!%p194_p9), %s3274_s5, 8 }
  0x16   : > { %v2379_v1 = vld [vmem:[%s3270_s1 + $0x8] sm:$0xff]  ;;  %v2378_v2 = vld [vmem:[%s3270_s1] sm:$0xff]  ;;  %s3288_s8 = smov (!%p222_p10, %s2189_s8), 127  ;;  %vm344_vm0 = vcmask 261120   ;;  %v2381_v24 = vld [vmem:[%s3270_s1 + $0x18] sm:$0xff] }
  0x17   : > { %447 = vmatpush.bf16.msra.mxu0 %v2379_v1  ;;  %s2190_s11 = sshll.u32 %s3288_s8, 3  ;;  %830 = vmatpush.bf16.msra.mxu1 %v2381_v24  ;;  %v2380_v25 = vld [vmem:[%s3270_s1 + $0x10] sm:$0xff]  ;;  %v2644_v33 = vld [vmem:[%s3271_s2] ss:$0 sm:$0xff] }
  0x18   : > { %s2607_s14 = scalar_lea.vmem %s3269_s0, %s2190_s11  ;;  %s218_s11 = sand.u32 1, %s2505_s21  }
  0x19   : > { %v228_v3 = vld [vmem:[%s2607_s14] sm:$0xff]  ;;  %v229_v4 = vld [vmem:[%s2607_s14 + $0x8] sm:$0xff]  ;;  %v230_v6 = vld [vmem:[%s2607_s14 + $0x10] sm:$0xff]  ;;  %s3224_s12 = sshll.u32 %s218_s11, 2  ;;  %s2110_s19 = scalar_lea.sflag [#allocation4], %s218_s11 }
  0x1a   : > { %v297_v5 = vpack.c.bf16 %v229_v4, %v228_v3  ;;  %v231_v7 = vld [vmem:[%s2607_s14 + $0x18] sm:$0xff]  ;;  %v232_v9 = vld [vmem:[%s2607_s14 + $0x20] sm:$0xff]  ;;  %v233_v10 = vld [vmem:[%s2607_s14 + $0x28] sm:$0xff]  ;;  %s220_s4 = scalar_lea.vmem [#allocation3], %s3224_s12 }
  0x1b   : > { %448 = vmatpush.bf16.msra.mxu0 %v2378_v2  ;;  %v298_v8 = vpack.c.bf16 %v231_v7, %v230_v6  ;;  %v299_v11 = vpack.c.bf16 %v233_v10, %v232_v9  ;;  %v234_v12 = vld [vmem:[%s2607_s14 + $0x30] sm:$0xff]  ;;  %v235_v13 = vld [vmem:[%s2607_s14 + $0x38] sm:$0xff]  ;;  %v236_v15 = vld [vmem:[%s2607_s14 + $0x40] sm:$0xff]  ;;  %831 = vmatpush.bf16.msra.mxu1 %v2380_v25  ;;  %s2122_s17 = sshll.u32 %s220_s4, 4  ;;  %s2123_s17 = int_to_ptr.vmem [resolvable:$true] %s2122_s17 }
  0x1c   : > { %v300_v14 = vpack.c.bf16 %v235_v13, %v234_v12  ;;  %v237_v16 = vld [vmem:[%s2607_s14 + $0x48] sm:$0xff]  ;;  %v238_v18 = vld [vmem:[%s2607_s14 + $0x50] sm:$0xff]  ;;  %v239_v19 = vld [vmem:[%s2607_s14 + $0x58] sm:$0xff] }
  0x1d   : > { %v301_v17 = vpack.c.bf16 %v237_v16, %v236_v15  ;;  %v302_v20 = vpack.c.bf16 %v239_v19, %v238_v18  ;;  %v240_v21 = vld [vmem:[%s2607_s14 + $0x60] sm:$0xff]  ;;  %v241_v22 = vld [vmem:[%s2607_s14 + $0x68] sm:$0xff]  ;;  %v242_v26 = vld [vmem:[%s2607_s14 + $0x70] sm:$0xff] }
  0x1e   : > { %2199 = vmatmul.msk.bf16.vlgmr.msra.gmra.mxu0 %vm344_vm0, %v297_v5  ;;  %v303_v23 = vpack.c.bf16 %v241_v22, %v240_v21  ;;  %v243_v27 = vld [vmem:[%s2607_s14 + $0x78] sm:$0xff]  ;;  %v244_v29 = vld [vmem:[%s2607_s14 + $0x80] sm:$0xff]  ;;  %v245_v30 = vld [vmem:[%s2607_s14 + $0x88] sm:$0xff] }
  0x1f   : > { %v304_v28 = vpack.c.bf16 %v243_v27, %v242_v26  ;;  %v305_v31 = vpack.c.bf16 %v245_v30, %v244_v29  ;;  %v246_v39 = vld [vmem:[%s2607_s14 + $0x90] sm:$0xff]  ;;  %v247_v40 = vld [vmem:[%s2607_s14 + $0x98] sm:$0xff]  ;;  %v248_v49 = vld [vmem:[%s2607_s14 + $0xa0] sm:$0xff] }
  0x20   : > { %v306_v42 = vpack.c.bf16 %v247_v40, %v246_v39  ;;  %v249_v50 = vld [vmem:[%s2607_s14 + $0xa8] sm:$0xff]  ;;  %v250_v59 = vld [vmem:[%s2607_s14 + $0xb0] sm:$0xff]  ;;  %v251_v60 = vld [vmem:[%s2607_s14 + $0xb8] sm:$0xff] }
  0x21   : > { %v307_v52 = vpack.c.bf16 %v249_v50, %v248_v49  ;;  %v308_v62 = vpack.c.bf16 %v251_v60, %v250_v59  ;;  %v252_v5 = vld [vmem:[%s2607_s14 + $0xc0] sm:$0xff]  ;;  %v253_v6 = vld [vmem:[%s2607_s14 + $0xc8] sm:$0xff]  ;;  %v254_v15 = vld [vmem:[%s2607_s14 + $0xd0] sm:$0xff] }
  0x22   : > { %v255_v16 = vld [vmem:[%s2607_s14 + $0xd8] sm:$0xff]  ;;  %v256_v25 = vld [vmem:[%s2607_s14 + $0xe0] sm:$0xff]  ;;  %v257_v26 = vld [vmem:[%s2607_s14 + $0xe8] sm:$0xff] }
  0x23   : > { %v310_v18 = vpack.c.bf16 %v255_v16, %v254_v15  ;;  %v261_v49 = vld [vmem:[%s2607_s14 + $0x108] sm:$0xff]  ;;  %v262_v59 = vld [vmem:[%s2607_s14 + $0x110] sm:$0xff]  ;;  %v263_v60 = vld [vmem:[%s2607_s14 + $0x118] sm:$0xff] }
  0x2e   : > { %2200 = vmatmul.msk.bf16.gmra.mxu0 %vm344_vm0, %v298_v8  ;;  %v309_v8 = vpack.c.bf16 %v253_v6, %v252_v5 }
  0x3e   : > { %2201 = vmatmul.msk.bf16.gmra.mxu0 %vm344_vm0, %v299_v11 }
  0x4e   : > { %2202 = vmatmul.msk.bf16.gmra.mxu0 %vm344_vm0, %v300_v14 }
  0x5e   : > { %2203 = vmatmul.msk.bf16.gmra.mxu0 %vm344_vm0, %v301_v17 }
  0x6e   : > { %2204 = vmatmul.msk.bf16.gmra.mxu0 %vm344_vm0, %v302_v20 }
  0x7e   : > { %2205 = vmatmul.msk.bf16.gmra.mxu0 %vm344_vm0, %v303_v23 }
  0x8e   : > { %2206 = vmatmul.msk.bf16.gmra.mxu0 %vm344_vm0, %v304_v28  ;;  %v311_v28 = vpack.c.bf16 %v257_v26, %v256_v25 }
  0x9b   : > { %v450_v32 = vpop.f32.mrf.mxu0 }
  0x9c   : > { %v451_v34 = vadd.f32 %v2644_v33, %v450_v32 }
  0x9e   : > { %2207 = vmatmul.msk.bf16.gmra.mxu0 %vm344_vm0, %v305_v31  ;;  %v610_v37 = vmax.f32 %v451_v34, 0.0 }
  0xa3   : > { %v452_v35 = vpop.f32.mrf.mxu0 }
  0xa4   : > { %v453_v36 = vadd.f32 %v2644_v33, %v452_v35 }
  0xa6   : > { %v611_v38 = vmax.f32 %v453_v36, 0.0  ;;  %v258_v36 = vld [vmem:[%s2607_s14 + $0xf0] sm:$0xff] }
  0xa8   : > { %v681_v41 = vpack.c.bf16 %v611_v38, %v610_v37  ;;  %v259_v37 = vld [vmem:[%s2607_s14 + $0xf8] sm:$0xff] }
  0xa9   : > { %v312_v39 = vpack.c.bf16 %v259_v37, %v258_v36 }
  0xaa   : > { %2244 = vmatmul.msk.bf16.vlgmr.msra.gmra.mxu1 %vm344_vm0, %v681_v41  ;;  %v2383_v41 = vld [vmem:[%s3270_s1 + $0x28] sm:$0xff] }
  0xab   : > { %v455_v43 = vpop.f32.mrf.mxu0  ;;  %1213 = vmatpush.bf16.msra.mxu2 %v2383_v41 }
  0xac   : > { %v456_v44 = vadd.f32 %v2644_v33, %v455_v43 }
  0xae   : > { %2208 = vmatmul.msk.bf16.gmra.mxu0 %vm344_vm0, %v306_v42  ;;  %v612_v47 = vmax.f32 %v456_v44, 0.0  ;;  %v2382_v42 = vld [vmem:[%s3270_s1 + $0x20] sm:$0xff] }
  0xaf   : > { %1214 = vmatpush.bf16.msra.mxu2 %v2382_v42 }
  0xb3   : > { %v457_v45 = vpop.f32.mrf.mxu0 }
  0xb4   : > { %v458_v46 = vadd.f32 %v2644_v33, %v457_v45 }
  0xb6   : > { %v613_v48 = vmax.f32 %v458_v46, 0.0 }
  0xb8   : > { %v682_v51 = vpack.c.bf16 %v613_v48, %v612_v47  ;;  %v260_v48 = vld [vmem:[%s2607_s14 + $0x100] sm:$0xff] }
  0xba   : > { %2245 = vmatmul.msk.bf16.gmra.mxu1 %vm344_vm0, %v682_v51  ;;  %v313_v51 = vpack.c.bf16 %v261_v49, %v260_v48  ;;  %v268_v48 = vld [vmem:[%s2607_s14 + $0x140] sm:$0xff]  ;;  %v269_v49 = vld [vmem:[%s2607_s14 + $0x148] sm:$0xff] }
  0xbb   : > { %v460_v53 = vpop.f32.mrf.mxu0 }
  0xbc   : > { %v461_v54 = vadd.f32 %v2644_v33, %v460_v53 }
  0xbe   : > { %2209 = vmatmul.msk.bf16.gmra.mxu0 %vm344_vm0, %v307_v52  ;;  %v614_v57 = vmax.f32 %v461_v54, 0.0 }
  0xc3   : > { %v462_v55 = vpop.f32.mrf.mxu0 }
  0xc4   : > { %v463_v56 = vadd.f32 %v2644_v33, %v462_v55 }
  0xc6   : > { %v615_v58 = vmax.f32 %v463_v56, 0.0 }
  0xc8   : > { %v683_v61 = vpack.c.bf16 %v615_v58, %v614_v57 }
  0xca   : > { %2246 = vmatmul.msk.bf16.gmra.mxu1 %vm344_vm0, %v683_v61 }
  0xcb   : > { %v465_v63 = vpop.f32.mrf.mxu0 }
  0xcc   : > { %v466_v0 = vadd.f32 %v2644_v33, %v465_v63  ;;  %v314_v63 = vpack.c.bf16 %v263_v60, %v262_v59 }
  0xce   : > { %2210 = vmatmul.msk.bf16.gmra.mxu0 %vm344_vm0, %v308_v62  ;;  %v616_v3 = vmax.f32 %v466_v0, 0.0  ;;  %v2708_v62 = vld [vmem:[%s3271_s2 + $0x1] ss:$0 sm:$0xff] }
  0xd3   : > { %v467_v1 = vpop.f32.mrf.mxu0 }
  0xd4   : > { %v468_v2 = vadd.f32 %v2644_v33, %v467_v1 }
  0xd6   : > { %v617_v4 = vmax.f32 %v468_v2, 0.0 }
  0xd8   : > { %v684_v7 = vpack.c.bf16 %v617_v4, %v616_v3 }
  0xda   : > { %2247 = vmatmul.msk.bf16.gmra.mxu1 %vm344_vm0, %v684_v7 }
  0xdb   : > { %v470_v9 = vpop.f32.mrf.mxu0 }
  0xdc   : > { %v471_v10 = vadd.f32 %v2644_v33, %v470_v9 }
  0xde   : > { %2211 = vmatmul.msk.bf16.gmra.mxu0 %vm344_vm0, %v309_v8  ;;  %v618_v13 = vmax.f32 %v471_v10, 0.0 }
  0xe3   : > { %v472_v11 = vpop.f32.mrf.mxu0 }
  0xe4   : > { %v473_v12 = vadd.f32 %v2644_v33, %v472_v11 }
  0xe6   : > { %v619_v14 = vmax.f32 %v473_v12, 0.0 }
  0xe8   : > { %v685_v17 = vpack.c.bf16 %v619_v14, %v618_v13  ;;  %v264_v13 = vld [vmem:[%s2607_s14 + $0x120] sm:$0xff]  ;;  %v265_v14 = vld [vmem:[%s2607_s14 + $0x128] sm:$0xff] }
  0xe9   : > { %v315_v16 = vpack.c.bf16 %v265_v14, %v264_v13 }
  0xea   : > { %2248 = vmatmul.msk.bf16.gmra.mxu1 %vm344_vm0, %v685_v17 }
  0xeb   : > { %v475_v19 = vpop.f32.mrf.mxu0 }
  0xec   : > { %v476_v20 = vadd.f32 %v2644_v33, %v475_v19 }
  0xee   : > { %2212 = vmatmul.msk.bf16.gmra.mxu0 %vm344_vm0, %v310_v18  ;;  %v620_v23 = vmax.f32 %v476_v20, 0.0 }
  0xf3   : > { %v477_v21 = vpop.f32.mrf.mxu0 }
  0xf4   : > { %v478_v22 = vadd.f32 %v2644_v33, %v477_v21 }
  0xf6   : > { %v621_v24 = vmax.f32 %v478_v22, 0.0 }
  0xf8   : > { %v686_v27 = vpack.c.bf16 %v621_v24, %v620_v23 }
  0xfa   : > { %2249 = vmatmul.msk.bf16.gmra.mxu1 %vm344_vm0, %v686_v27 }
  0xfb   : > { %v480_v29 = vpop.f32.mrf.mxu0 }
  0xfc   : > { %v481_v30 = vadd.f32 %v2644_v33, %v480_v29 }
  0xfe   : > { %2213 = vmatmul.msk.bf16.gmra.mxu0 %vm344_vm0, %v311_v28  ;;  %v622_v34 = vmax.f32 %v481_v30, 0.0  ;;  %v266_v30 = vld [vmem:[%s2607_s14 + $0x130] sm:$0xff] }
 0x103   : > { %v482_v31 = vpop.f32.mrf.mxu0 }
 0x104   : > { %v483_v32 = vadd.f32 %v2644_v33, %v482_v31  ;;  %v267_v31 = vld [vmem:[%s2607_s14 + $0x138] sm:$0xff] }
 0x106   : > { %v623_v35 = vmax.f32 %v483_v32, 0.0 }
 0x108   : > { %v687_v38 = vpack.c.bf16 %v623_v35, %v622_v34  ;;  %v316_v34 = vpack.c.bf16 %v267_v31, %v266_v30 }
 0x10a   : > { %2250 = vmatmul.msk.bf16.gmra.mxu1 %vm344_vm0, %v687_v38 }
 0x10b   : > { %v485_v40 = vpop.f32.mrf.mxu0 }
 0x10c   : > { %v486_v43 = vadd.f32 %v2644_v33, %v485_v40 }
 0x10e   : > { %2214 = vmatmul.msk.bf16.gmra.mxu0 %vm344_vm0, %v312_v39  ;;  %v624_v46 = vmax.f32 %v486_v43, 0.0 }
 0x113   : > { %v487_v44 = vpop.f32.mrf.mxu0 }
 0x114   : > { %v488_v45 = vadd.f32 %v2644_v33, %v487_v44 }
 0x116   : > { %v625_v47 = vmax.f32 %v488_v45, 0.0 }
 0x118   : > { %v688_v50 = vpack.c.bf16 %v625_v47, %v624_v46 }
 0x11a   : > { %2251 = vmatmul.msk.bf16.gmra.mxu1 %vm344_vm0, %v688_v50 }
 0x11b   : > { %v490_v52 = vpop.f32.mrf.mxu0 }
 0x11c   : > { %v491_v53 = vadd.f32 %v2644_v33, %v490_v52 }
 0x11e   : > { %2215 = vmatmul.msk.bf16.gmra.mxu0 %vm344_vm0, %v313_v51  ;;  %v626_v56 = vmax.f32 %v491_v53, 0.0  ;;  %v317_v51 = vpack.c.bf16 %v269_v49, %v268_v48 }
 0x123   : > { %v492_v54 = vpop.f32.mrf.mxu0 }
 0x124   : > { %v493_v55 = vadd.f32 %v2644_v33, %v492_v54 }
 0x126   : > { %v627_v57 = vmax.f32 %v493_v55, 0.0 }
 0x127   : > { %v833_v58 = vpop.f32.mrf.mxu1 }
 0x128   : > { %v689_v61 = vpack.c.bf16 %v627_v57, %v626_v56  ;;  %v834_v1 = vadd.f32 %v2708_v62, %v833_v58 }
 0x12a   : > { %2252 = vmatmul.msk.bf16.gmra.mxu1 %vm344_vm0, %v689_v61  ;;  %v993_v4 = vmax.f32 %v834_v1, 0.0 }
 0x12b   : > { %v495_v0 = vpop.f32.mrf.mxu0 }
 0x12c   : > { %v496_v5 = vadd.f32 %v2644_v33, %v495_v0 }
 0x12e   : > { %2216 = vmatmul.msk.bf16.gmra.mxu0 %vm344_vm0, %v314_v63  ;;  %v628_v10 = vmax.f32 %v496_v5, 0.0 }
 0x12f   : > { %v835_v2 = vpop.f32.mrf.mxu1 }
 0x130   : > { %v836_v3 = vadd.f32 %v2708_v62, %v835_v2  ;;  %v270_v2 = vld [vmem:[%s2607_s14 + $0x150] sm:$0xff] }
 0x132   : > { %v994_v6 = vmax.f32 %v836_v3, 0.0  ;;  %v271_v3 = vld [vmem:[%s2607_s14 + $0x158] sm:$0xff] }
 0x133   : > { %v497_v7 = vpop.f32.mrf.mxu0  ;;  %v318_v5 = vpack.c.bf16 %v271_v3, %v270_v2 }
 0x134   : > { %v498_v8 = vadd.f32 %v2644_v33, %v497_v7  ;;  %v1064_v9 = vpack.c.bf16 %v994_v6, %v993_v4 }
 0x136   : > { %v629_v11 = vmax.f32 %v498_v8, 0.0  ;;  %2289 = vmatmul.msk.bf16.vlgmr.msra.gmra.mxu2 %vm344_vm0, %v1064_v9 }
 0x137   : > { %v838_v12 = vpop.f32.mrf.mxu1 }
 0x138   : > { %v690_v15 = vpack.c.bf16 %v629_v11, %v628_v10  ;;  %v839_v18 = vadd.f32 %v2708_v62, %v838_v12 }
 0x13a   : > { %2253 = vmatmul.msk.bf16.gmra.mxu1 %vm344_vm0, %v690_v15  ;;  %v995_v21 = vmax.f32 %v839_v18, 0.0 }
 0x13b   : > { %v500_v17 = vpop.f32.mrf.mxu0 }
 0x13c   : > { %v501_v22 = vadd.f32 %v2644_v33, %v500_v17 }
 0x13e   : > { %2217 = vmatmul.msk.bf16.gmra.mxu0 %vm344_vm0, %v315_v16  ;;  %v630_v27 = vmax.f32 %v501_v22, 0.0 }
 0x13f   : > { %v840_v19 = vpop.f32.mrf.mxu1 }
 0x140   : > { %v841_v20 = vadd.f32 %v2708_v62, %v840_v19  ;;  %v272_v19 = vld [vmem:[%s2607_s14 + $0x160] sm:$0xff] }
 0x142   : > { %v996_v23 = vmax.f32 %v841_v20, 0.0  ;;  %v273_v20 = vld [vmem:[%s2607_s14 + $0x168] sm:$0xff] }
 0x143   : > { %v502_v24 = vpop.f32.mrf.mxu0  ;;  %v319_v22 = vpack.c.bf16 %v273_v20, %v272_v19 }
 0x144   : > { %v503_v25 = vadd.f32 %v2644_v33, %v502_v24  ;;  %v1065_v26 = vpack.c.bf16 %v996_v23, %v995_v21 }
 0x146   : > { %v631_v28 = vmax.f32 %v503_v25, 0.0  ;;  %2290 = vmatmul.msk.bf16.gmra.mxu2 %vm344_vm0, %v1065_v26 }
 0x147   : > { %v843_v29 = vpop.f32.mrf.mxu1 }
 0x148   : > { %v691_v32 = vpack.c.bf16 %v631_v28, %v630_v27  ;;  %v844_v36 = vadd.f32 %v2708_v62, %v843_v29 }
 0x14a   : > { %2254 = vmatmul.msk.bf16.gmra.mxu1 %vm344_vm0, %v691_v32  ;;  %v997_v39 = vmax.f32 %v844_v36, 0.0 }
 0x14b   : > { %v505_v35 = vpop.f32.mrf.mxu0 }
 0x14c   : > { %v506_v40 = vadd.f32 %v2644_v33, %v505_v35 }
 0x14e   : > { %2218 = vmatmul.msk.bf16.gmra.mxu0 %vm344_vm0, %v316_v34  ;;  %v632_v45 = vmax.f32 %v506_v40, 0.0 }
 0x14f   : > { %v845_v37 = vpop.f32.mrf.mxu1 }
 0x150   : > { %v846_v38 = vadd.f32 %v2708_v62, %v845_v37  ;;  %v274_v37 = vld [vmem:[%s2607_s14 + $0x170] sm:$0xff] }
 0x152   : > { %v998_v41 = vmax.f32 %v846_v38, 0.0  ;;  %v275_v38 = vld [vmem:[%s2607_s14 + $0x178] sm:$0xff] }
 0x153   : > { %v507_v42 = vpop.f32.mrf.mxu0  ;;  %v320_v40 = vpack.c.bf16 %v275_v38, %v274_v37 }
 0x154   : > { %v508_v43 = vadd.f32 %v2644_v33, %v507_v42  ;;  %v1066_v44 = vpack.c.bf16 %v998_v41, %v997_v39 }
 0x156   : > { %v633_v46 = vmax.f32 %v508_v43, 0.0  ;;  %2291 = vmatmul.msk.bf16.gmra.mxu2 %vm344_vm0, %v1066_v44 }
 0x157   : > { %v848_v47 = vpop.f32.mrf.mxu1 }
 0x158   : > { %v692_v50 = vpack.c.bf16 %v633_v46, %v632_v45  ;;  %v849_v53 = vadd.f32 %v2708_v62, %v848_v47 }
 0x15a   : > { %2255 = vmatmul.msk.bf16.gmra.mxu1 %vm344_vm0, %v692_v50  ;;  %v999_v56 = vmax.f32 %v849_v53, 0.0 }
 0x15b   : > { %v510_v52 = vpop.f32.mrf.mxu0 }
 0x15c   : > { %v511_v57 = vadd.f32 %v2644_v33, %v510_v52 }
 0x15e   : > { %2219 = vmatmul.msk.bf16.gmra.mxu0 %vm344_vm0, %v317_v51  ;;  %v634_v63 = vmax.f32 %v511_v57, 0.0 }
 0x15f   : > { %v850_v54 = vpop.f32.mrf.mxu1 }
 0x160   : > { %v851_v55 = vadd.f32 %v2708_v62, %v850_v54  ;;  %v276_v54 = vld [vmem:[%s2607_s14 + $0x180] sm:$0xff] }
 0x162   : > { %v1000_v58 = vmax.f32 %v851_v55, 0.0  ;;  %v277_v55 = vld [vmem:[%s2607_s14 + $0x188] sm:$0xff] }
 0x163   : > { %v512_v59 = vpop.f32.mrf.mxu0  ;;  %v321_v57 = vpack.c.bf16 %v277_v55, %v276_v54  ;;  %v283_v54 = vld [vmem:[%s2607_s14 + $0x1b8] sm:$0xff] }
 0x164   : > { %v513_v60 = vadd.f32 %v2644_v33, %v512_v59  ;;  %v1067_v61 = vpack.c.bf16 %v1000_v58, %v999_v56 }
 0x166   : > { %v635_v0 = vmax.f32 %v513_v60, 0.0  ;;  %2292 = vmatmul.msk.bf16.gmra.mxu2 %vm344_vm0, %v1067_v61  ;;  %v2385_v61 = vld [vmem:[%s3270_s1 + $0x38] sm:$0xff] }
 0x167   : > { %v853_v1 = vpop.f32.mrf.mxu1  ;;  %1596 = vmatpush.bf16.msra.mxu3 %v2385_v61 }
 0x168   : > { %v693_v4 = vpack.c.bf16 %v635_v0, %v634_v63  ;;  %v854_v7 = vadd.f32 %v2708_v62, %v853_v1 }
 0x16a   : > { %2256 = vmatmul.msk.bf16.gmra.mxu1 %vm344_vm0, %v693_v4  ;;  %v1001_v10 = vmax.f32 %v854_v7, 0.0  ;;  %v2384_v4 = vld [vmem:[%s3270_s1 + $0x30] sm:$0xff] }
 0x16b   : > { %v515_v6 = vpop.f32.mrf.mxu0  ;;  %1597 = vmatpush.bf16.msra.mxu3 %v2384_v4 }
 0x16c   : > { %v516_v11 = vadd.f32 %v2644_v33, %v515_v6 }
 0x16e   : > { %2220 = vmatmul.msk.bf16.gmra.mxu0 %vm344_vm0, %v318_v5  ;;  %v636_v16 = vmax.f32 %v516_v11, 0.0  ;;  %v279_v11 = vld [vmem:[%s2607_s14 + $0x198] sm:$0xff] }
 0x16f   : > { %v855_v8 = vpop.f32.mrf.mxu1 }
 0x170   : > { %v856_v9 = vadd.f32 %v2708_v62, %v855_v8 }
 0x172   : > { %v1002_v12 = vmax.f32 %v856_v9, 0.0 }
 0x173   : > { %v517_v13 = vpop.f32.mrf.mxu0 }
 0x174   : > { %v518_v14 = vadd.f32 %v2644_v33, %v517_v13  ;;  %v1068_v15 = vpack.c.bf16 %v1002_v12, %v1001_v10  ;;  %v278_v10 = vld [vmem:[%s2607_s14 + $0x190] sm:$0xff] }
 0x175   : > { %v322_v13 = vpack.c.bf16 %v279_v11, %v278_v10 }
 0x176   : > { %v637_v17 = vmax.f32 %v518_v14, 0.0  ;;  %2293 = vmatmul.msk.bf16.gmra.mxu2 %vm344_vm0, %v1068_v15 }
 0x177   : > { %v858_v18 = vpop.f32.mrf.mxu1 }
 0x178   : > { %v694_v21 = vpack.c.bf16 %v637_v17, %v636_v16  ;;  %v859_v24 = vadd.f32 %v2708_v62, %v858_v18 }
 0x17a   : > { %2257 = vmatmul.msk.bf16.gmra.mxu1 %vm344_vm0, %v694_v21  ;;  %v1003_v27 = vmax.f32 %v859_v24, 0.0 }
 0x17b   : > { %v520_v23 = vpop.f32.mrf.mxu0 }
 0x17c   : > { %v521_v28 = vadd.f32 %v2644_v33, %v520_v23 }
 0x17e   : > { %2221 = vmatmul.msk.bf16.gmra.mxu0 %vm344_vm0, %v319_v22  ;;  %v638_v34 = vmax.f32 %v521_v28, 0.0  ;;  %v281_v28 = vld [vmem:[%s2607_s14 + $0x1a8] sm:$0xff] }
 0x17f   : > { %v860_v25 = vpop.f32.mrf.mxu1 }
 0x180   : > { %v861_v26 = vadd.f32 %v2708_v62, %v860_v25 }
 0x182   : > { %v1004_v29 = vmax.f32 %v861_v26, 0.0 }
 0x183   : > { %v522_v30 = vpop.f32.mrf.mxu0 }
 0x184   : > { %v523_v31 = vadd.f32 %v2644_v33, %v522_v30  ;;  %v1069_v32 = vpack.c.bf16 %v1004_v29, %v1003_v27  ;;  %v280_v27 = vld [vmem:[%s2607_s14 + $0x1a0] sm:$0xff] }
 0x186   : > { %v639_v35 = vmax.f32 %v523_v31, 0.0  ;;  %2294 = vmatmul.msk.bf16.gmra.mxu2 %vm344_vm0, %v1069_v32  ;;  %v323_v31 = vpack.c.bf16 %v281_v28, %v280_v27 }
 0x187   : > { %v863_v36 = vpop.f32.mrf.mxu1 }
 0x188   : > { %v695_v39 = vpack.c.bf16 %v639_v35, %v638_v34  ;;  %v864_v42 = vadd.f32 %v2708_v62, %v863_v36  ;;  %v2801_v34 = vld [vmem:[%s3271_s2 + $0x2] ss:$0 sm:$0xff] }
 0x18a   : > { %2258 = vmatmul.msk.bf16.gmra.mxu1 %vm344_vm0, %v695_v39  ;;  %v1005_v45 = vmax.f32 %v864_v42, 0.0 }
 0x18b   : > { %v525_v41 = vpop.f32.mrf.mxu0 }
 0x18c   : > { %v526_v46 = vadd.f32 %v2644_v33, %v525_v41 }
 0x18e   : > { %2222 = vmatmul.msk.bf16.gmra.mxu0 %vm344_vm0, %v320_v40  ;;  %v640_v51 = vmax.f32 %v526_v46, 0.0 }
 0x18f   : > { %v865_v43 = vpop.f32.mrf.mxu1 }
 0x190   : > { %v866_v44 = vadd.f32 %v2708_v62, %v865_v43 }
 0x192   : > { %v1006_v47 = vmax.f32 %v866_v44, 0.0 }
 0x193   : > { %v527_v48 = vpop.f32.mrf.mxu0 }
 0x194   : > { %v528_v49 = vadd.f32 %v2644_v33, %v527_v48  ;;  %v1070_v50 = vpack.c.bf16 %v1006_v47, %v1005_v45 }
 0x196   : > { %v641_v52 = vmax.f32 %v528_v49, 0.0  ;;  %2295 = vmatmul.msk.bf16.gmra.mxu2 %vm344_vm0, %v1070_v50 }
 0x197   : > { %v868_v53 = vpop.f32.mrf.mxu1 }
 0x198   : > { %v696_v56 = vpack.c.bf16 %v641_v52, %v640_v51  ;;  %v869_v59 = vadd.f32 %v2708_v62, %v868_v53  ;;  %v282_v53 = vld [vmem:[%s2607_s14 + $0x1b0] sm:$0xff] }
 0x19a   : > { %2259 = vmatmul.msk.bf16.gmra.mxu1 %vm344_vm0, %v696_v56  ;;  %v1007_v0 = vmax.f32 %v869_v59, 0.0 }
 0x19b   : > { %v530_v58 = vpop.f32.mrf.mxu0 }
 0x19c   : > { %v531_v1 = vadd.f32 %v2644_v33, %v530_v58 }
 0x19e   : > { %2223 = vmatmul.msk.bf16.gmra.mxu0 %vm344_vm0, %v321_v57  ;;  %v642_v7 = vmax.f32 %v531_v1, 0.0  ;;  %v324_v57 = vpack.c.bf16 %v283_v54, %v282_v53 }
 0x19f   : > { %v870_v60 = vpop.f32.mrf.mxu1 }
 0x1a0   : > { %v871_v63 = vadd.f32 %v2708_v62, %v870_v60 }
 0x1a2   : > { %v1008_v2 = vmax.f32 %v871_v63, 0.0 }
 0x1a3   : > { %v532_v3 = vpop.f32.mrf.mxu0 }
 0x1a4   : > { %v533_v5 = vadd.f32 %v2644_v33, %v532_v3  ;;  %v1071_v6 = vpack.c.bf16 %v1008_v2, %v1007_v0 }
 0x1a6   : > { %v643_v8 = vmax.f32 %v533_v5, 0.0  ;;  %2296 = vmatmul.msk.bf16.gmra.mxu2 %vm344_vm0, %v1071_v6 }
 0x1a7   : > { %v873_v9 = vpop.f32.mrf.mxu1 }
 0x1a8   : > { %v697_v12 = vpack.c.bf16 %v643_v8, %v642_v7  ;;  %v874_v15 = vadd.f32 %v2708_v62, %v873_v9 }
 0x1aa   : > { %2260 = vmatmul.msk.bf16.gmra.mxu1 %vm344_vm0, %v697_v12  ;;  %v1009_v18 = vmax.f32 %v874_v15, 0.0  ;;  %v285_v15 = vld [vmem:[%s2607_s14 + $0x1c8] sm:$0xff] }
 0x1ab   : > { %v535_v14 = vpop.f32.mrf.mxu0 }
 0x1ac   : > { %v536_v19 = vadd.f32 %v2644_v33, %v535_v14  ;;  %v284_v14 = vld [vmem:[%s2607_s14 + $0x1c0] sm:$0xff] }
 0x1ae   : > { %2224 = vmatmul.msk.bf16.gmra.mxu0 %vm344_vm0, %v322_v13  ;;  %v644_v24 = vmax.f32 %v536_v19, 0.0 }
 0x1af   : > { %v875_v16 = vpop.f32.mrf.mxu1 }
 0x1b0   : > { %v876_v17 = vadd.f32 %v2708_v62, %v875_v16 }
 0x1b2   : > { %v1010_v20 = vmax.f32 %v876_v17, 0.0 }
 0x1b3   : > { %v537_v21 = vpop.f32.mrf.mxu0 }
 0x1b4   : > { %v538_v22 = vadd.f32 %v2644_v33, %v537_v21  ;;  %v1072_v23 = vpack.c.bf16 %v1010_v20, %v1009_v18  ;;  %v325_v18 = vpack.c.bf16 %v285_v15, %v284_v14 }
 0x1b6   : > { %v645_v25 = vmax.f32 %v538_v22, 0.0  ;;  %2297 = vmatmul.msk.bf16.gmra.mxu2 %vm344_vm0, %v1072_v23 }
 0x1b7   : > { %v878_v26 = vpop.f32.mrf.mxu1 }
 0x1b8   : > { %v698_v29 = vpack.c.bf16 %v645_v25, %v644_v24  ;;  %v879_v35 = vadd.f32 %v2708_v62, %v878_v26 }
 0x1b9   : > { %v1216_v30 = vpop.f32.mrf.mxu2 }
 0x1ba   : > { %2261 = vmatmul.msk.bf16.gmra.mxu1 %vm344_vm0, %v698_v29  ;;  %v1217_v37 = vadd.f32 %v2801_v34, %v1216_v30  ;;  %v1011_v40 = vmax.f32 %v879_v35, 0.0 }
 0x1bb   : > { %v540_v32 = vpop.f32.mrf.mxu0 }
 0x1bc   : > { %v541_v41 = vadd.f32 %v2644_v33, %v540_v32  ;;  %v1376_v45 = vmax.f32 %v1217_v37, 0.0 }
 0x1be   : > { %2225 = vmatmul.msk.bf16.gmra.mxu0 %vm344_vm0, %v323_v31  ;;  %v646_v49 = vmax.f32 %v541_v41, 0.0  ;;  %v287_v41 = vld [vmem:[%s2607_s14 + $0x1d8] sm:$0xff] }
 0x1bf   : > { %v880_v36 = vpop.f32.mrf.mxu1 }
 0x1c0   : > { %v881_v38 = vadd.f32 %v2708_v62, %v880_v36 }
 0x1c1   : > { %v1218_v39 = vpop.f32.mrf.mxu2 }
 0x1c2   : > { %v1012_v42 = vmax.f32 %v881_v38, 0.0  ;;  %v1219_v43 = vadd.f32 %v2801_v34, %v1218_v39 }
 0x1c3   : > { %v542_v44 = vpop.f32.mrf.mxu0 }
 0x1c4   : > { %v1377_v46 = vmax.f32 %v1219_v43, 0.0  ;;  %v543_v47 = vadd.f32 %v2644_v33, %v542_v44  ;;  %v1073_v48 = vpack.c.bf16 %v1012_v42, %v1011_v40  ;;  %v286_v40 = vld [vmem:[%s2607_s14 + $0x1d0] sm:$0xff] }
 0x1c5   : > { %v326_v44 = vpack.c.bf16 %v287_v41, %v286_v40 }
 0x1c6   : > { %v647_v50 = vmax.f32 %v543_v47, 0.0  ;;  %2298 = vmatmul.msk.bf16.gmra.mxu2 %vm344_vm0, %v1073_v48  ;;  %v1447_v51 = vpack.c.bf16 %v1377_v46, %v1376_v45 }
 0x1c7   : > { %v883_v52 = vpop.f32.mrf.mxu1 }
 0x1c8   : > { %v699_v55 = vpack.c.bf16 %v647_v50, %v646_v49  ;;  %2334 = vmatmul.msk.bf16.vlgmr.msra.gmra.mxu3 %vm344_vm0, %v1447_v51  ;;  %v884_v59 = vadd.f32 %v2708_v62, %v883_v52 }
 0x1c9   : > { %v1221_v56 = vpop.f32.mrf.mxu2 }
 0x1ca   : > { %2262 = vmatmul.msk.bf16.gmra.mxu1 %vm344_vm0, %v699_v55  ;;  %v1222_v61 = vadd.f32 %v2801_v34, %v1221_v56  ;;  %v1013_v1 = vmax.f32 %v884_v59, 0.0 }
 0x1cb   : > { %v545_v58 = vpop.f32.mrf.mxu0 }
 0x1cc   : > { %v546_v2 = vadd.f32 %v2644_v33, %v545_v58  ;;  %v1378_v6 = vmax.f32 %v1222_v61, 0.0 }
 0x1ce   : > { %2226 = vmatmul.msk.bf16.gmra.mxu0 %vm344_vm0, %v324_v57  ;;  %v648_v10 = vmax.f32 %v546_v2, 0.0  ;;  %v289_v2 = vld [vmem:[%s2607_s14 + $0x1e8] sm:$0xff] }
 0x1cf   : > { %v885_v60 = vpop.f32.mrf.mxu1 }
 0x1d0   : > { %v886_v63 = vadd.f32 %v2708_v62, %v885_v60 }
 0x1d1   : > { %v1223_v0 = vpop.f32.mrf.mxu2 }
 0x1d2   : > { %v1014_v3 = vmax.f32 %v886_v63, 0.0  ;;  %v1224_v4 = vadd.f32 %v2801_v34, %v1223_v0 }
 0x1d3   : > { %v547_v5 = vpop.f32.mrf.mxu0 }
 0x1d4   : > { %v1379_v7 = vmax.f32 %v1224_v4, 0.0  ;;  %v548_v8 = vadd.f32 %v2644_v33, %v547_v5  ;;  %v1074_v9 = vpack.c.bf16 %v1014_v3, %v1013_v1  ;;  %v288_v1 = vld [vmem:[%s2607_s14 + $0x1e0] sm:$0xff] }
 0x1d5   : > { %v327_v5 = vpack.c.bf16 %v289_v2, %v288_v1 }
 0x1d6   : > { %v649_v11 = vmax.f32 %v548_v8, 0.0  ;;  %2299 = vmatmul.msk.bf16.gmra.mxu2 %vm344_vm0, %v1074_v9  ;;  %v1448_v12 = vpack.c.bf16 %v1379_v7, %v1378_v6 }
 0x1d7   : > { %v888_v13 = vpop.f32.mrf.mxu1 }
 0x1d8   : > { %v700_v16 = vpack.c.bf16 %v649_v11, %v648_v10  ;;  %2335 = vmatmul.msk.bf16.gmra.mxu3 %vm344_vm0, %v1448_v12  ;;  %v889_v20 = vadd.f32 %v2708_v62, %v888_v13 }
 0x1d9   : > { %v1226_v17 = vpop.f32.mrf.mxu2 }
 0x1da   : > { %2263 = vmatmul.msk.bf16.gmra.mxu1 %vm344_vm0, %v700_v16  ;;  %v1227_v22 = vadd.f32 %v2801_v34, %v1226_v17  ;;  %v1015_v25 = vmax.f32 %v889_v20, 0.0 }
 0x1db   : > { %v550_v19 = vpop.f32.mrf.mxu0 }
 0x1dc   : > { %v551_v26 = vadd.f32 %v2644_v33, %v550_v19  ;;  %v1380_v30 = vmax.f32 %v1227_v22, 0.0 }
 0x1de   : > { %2227 = vmatmul.msk.bf16.gmra.mxu0 %vm344_vm0, %v325_v18  ;;  %v650_v36 = vmax.f32 %v551_v26, 0.0  ;;  %v291_v26 = vld [vmem:[%s2607_s14 + $0x1f8] sm:$0xff] }
 0x1df   : > { %v890_v21 = vpop.f32.mrf.mxu1 }
 0x1e0   : > { %v891_v23 = vadd.f32 %v2708_v62, %v890_v21 }
 0x1e1   : > { %v1228_v24 = vpop.f32.mrf.mxu2 }
 0x1e2   : > { %v1016_v27 = vmax.f32 %v891_v23, 0.0  ;;  %v1229_v28 = vadd.f32 %v2801_v34, %v1228_v24 }
 0x1e3   : > { %v552_v29 = vpop.f32.mrf.mxu0 }
 0x1e4   : > { %v1381_v31 = vmax.f32 %v1229_v28, 0.0  ;;  %v553_v32 = vadd.f32 %v2644_v33, %v552_v29  ;;  %v1075_v35 = vpack.c.bf16 %v1016_v27, %v1015_v25  ;;  %v290_v25 = vld [vmem:[%s2607_s14 + $0x1f0] sm:$0xff]  ;;  %s2120_s14 = scalar_lea.hbm %s3274_s5, %s2375_s13 }
 0x1e5   : > { %v328_v29 = vpack.c.bf16 %v291_v26, %v290_v25  ;;  %s2124_s18 = sshll.u32 %s2120_s14, 4  ;;  %s2125_s18 = int_to_ptr.hbm [resolvable:$true] %s2124_s18 }
 0x1e6   : > { %v651_v37 = vmax.f32 %v553_v32, 0.0  ;;  %2300 = vmatmul.msk.bf16.gmra.mxu2 %vm344_vm0, %v1075_v35  ;;  %v1449_v38 = vpack.c.bf16 %v1381_v31, %v1380_v30  ;;  %s2465_s24 = sshra.s32 %s2125_s18, 4  ;;  %s2466_s24 = int_to_ptr.hbm [resolvable:$true] %s2465_s24 }
 0x1e7   : > { %v893_v39 = vpop.f32.mrf.mxu1  ;;  %s2467_s26 = scalar_lea.hbm %s2466_s24, 4  ;;  %p2472_p0 = scmp.lt.s32.totalorder %s2466_s24, %s3274_s5 }
 0x1e8   : > { %v701_v42 = vpack.c.bf16 %v651_v37, %v650_v36  ;;  %2336 = vmatmul.msk.bf16.gmra.mxu3 %vm344_vm0, %v1449_v38  ;;  %v894_v46 = vadd.f32 %v2708_v62, %v893_v39  ;;  %p2468_p11 = scmp.ne.s32.totalorder %s2466_s24, %s2467_s26  ;;  %p2473_p1 = scmp.lt.s32.totalorder %s2471_s7, %s2467_s26 }
 0x1e9   : > { %v1231_v43 = vpop.f32.mrf.mxu2 }
 0x1ea   : > { %2264 = vmatmul.msk.bf16.gmra.mxu1 %vm344_vm0, %v701_v42  ;;  %v1232_v48 = vadd.f32 %v2801_v34, %v1231_v43  ;;  %v1017_v51 = vmax.f32 %v894_v46, 0.0  ;;  %p2469_p12 = pnand %p2468_p11, %p2587_p5  ;;  %p2474_p2 = por %p2473_p1, %p2472_p0 }
 0x1eb   : > { %v555_v45 = vpop.f32.mrf.mxu0 }
 0x1ec   : > { %v556_v52 = vadd.f32 %v2644_v33, %v555_v45  ;;  %v1382_v56 = vmax.f32 %v1232_v48, 0.0  ;;  %p2470_p13 = pneg %p2469_p12 }
 0x1ee   : > { %2228 = vmatmul.msk.bf16.gmra.mxu0 %vm344_vm0, %v326_v44  ;;  %v652_v60 = vmax.f32 %v556_v52, 0.0  ;;  %p2475_p3 = pnand %p2474_p2, %p2470_p13 }
 0x1ef   : > { %v895_v47 = vpop.f32.mrf.mxu1 }
 0x1f0   : > { %v896_v49 = vadd.f32 %v2708_v62, %v895_v47 }
 0x1f1   : > { %v1233_v50 = vpop.f32.mrf.mxu2 }
 0x1f2   : > { %v1018_v53 = vmax.f32 %v896_v49, 0.0  ;;  %v1234_v54 = vadd.f32 %v2801_v34, %v1233_v50 }
 0x1f3   : > { %v557_v55 = vpop.f32.mrf.mxu0 }
 0x1f4   : > { %v1076_v57 = vpack.c.bf16 %v1018_v53, %v1017_v51  ;;  %v1383_v58 = vmax.f32 %v1234_v54, 0.0  ;;  %v558_v59 = vadd.f32 %v2644_v33, %v557_v55 }
 0x1f6   : > { %v653_v61 = vmax.f32 %v558_v59, 0.0  ;;  %2301 = vmatmul.msk.bf16.gmra.mxu2 %vm344_vm0, %v1076_v57  ;;  %v1450_v63 = vpack.c.bf16 %v1383_v58, %v1382_v56 }
 0x1f7   : > { %v898_v0 = vpop.f32.mrf.mxu1 }
 0x1f8   : > { %v702_v3 = vpack.c.bf16 %v653_v61, %v652_v60  ;;  %2337 = vmatmul.msk.bf16.gmra.mxu3 %vm344_vm0, %v1450_v63  ;;  %v899_v7 = vadd.f32 %v2708_v62, %v898_v0 }
 0x1f9   : > { %v1236_v4 = vpop.f32.mrf.mxu2 }
 0x1fa   : > { %2265 = vmatmul.msk.bf16.gmra.mxu1 %vm344_vm0, %v702_v3  ;;  %v1237_v9 = vadd.f32 %v2801_v34, %v1236_v4  ;;  %v1019_v12 = vmax.f32 %v899_v7, 0.0 }
 0x1fb   : > { %v560_v6 = vpop.f32.mrf.mxu0 }
 0x1fc   : > { %v561_v13 = vadd.f32 %v2644_v33, %v560_v6  ;;  %v1384_v17 = vmax.f32 %v1237_v9, 0.0 }
 0x1fe   : > { %2229 = vmatmul.msk.bf16.gmra.mxu0 %vm344_vm0, %v327_v5  ;;  %v654_v21 = vmax.f32 %v561_v13, 0.0 }
 0x1ff   : > { %v900_v8 = vpop.f32.mrf.mxu1 }
 0x200   : > { %v901_v10 = vadd.f32 %v2708_v62, %v900_v8 }
 0x201   : > { %v1238_v11 = vpop.f32.mrf.mxu2 }
 0x202   : > { %v1020_v14 = vmax.f32 %v901_v10, 0.0  ;;  %v1239_v15 = vadd.f32 %v2801_v34, %v1238_v11 }
 0x203   : > { %v562_v16 = vpop.f32.mrf.mxu0 }
 0x204   : > { %v1077_v18 = vpack.c.bf16 %v1020_v14, %v1019_v12  ;;  %v1385_v19 = vmax.f32 %v1239_v15, 0.0  ;;  %v563_v20 = vadd.f32 %v2644_v33, %v562_v16 }
 0x206   : > { %v655_v22 = vmax.f32 %v563_v20, 0.0  ;;  %2302 = vmatmul.msk.bf16.gmra.mxu2 %vm344_vm0, %v1077_v18  ;;  %v1451_v23 = vpack.c.bf16 %v1385_v19, %v1384_v17 }
 0x207   : > { %v903_v24 = vpop.f32.mrf.mxu1 }
 0x208   : > { %v703_v27 = vpack.c.bf16 %v655_v22, %v654_v21  ;;  %2338 = vmatmul.msk.bf16.gmra.mxu3 %vm344_vm0, %v1451_v23  ;;  %v904_v31 = vadd.f32 %v2708_v62, %v903_v24 }
 0x209   : > { %v1241_v28 = vpop.f32.mrf.mxu2 }
 0x20a   : > { %2266 = vmatmul.msk.bf16.gmra.mxu1 %vm344_vm0, %v703_v27  ;;  %v1242_v35 = vadd.f32 %v2801_v34, %v1241_v28  ;;  %v1021_v38 = vmax.f32 %v904_v31, 0.0 }
 0x20b   : > { %v565_v30 = vpop.f32.mrf.mxu0 }
 0x20c   : > { %v566_v39 = vadd.f32 %v2644_v33, %v565_v30  ;;  %v1386_v43 = vmax.f32 %v1242_v35, 0.0 }
 0x20e   : > { %2230 = vmatmul.msk.bf16.gmra.mxu0 %vm344_vm0, %v328_v29  ;;  %v656_v47 = vmax.f32 %v566_v39, 0.0 }
 0x20f   : > { %v905_v32 = vpop.f32.mrf.mxu1 }
 0x210   : > { %v906_v36 = vadd.f32 %v2708_v62, %v905_v32 }
 0x211   : > { %v1243_v37 = vpop.f32.mrf.mxu2 }
 0x212   : > { %v1022_v40 = vmax.f32 %v906_v36, 0.0  ;;  %v1244_v41 = vadd.f32 %v2801_v34, %v1243_v37 }
 0x213   : > { %v567_v42 = vpop.f32.mrf.mxu0 }
 0x214   : > { %v1078_v44 = vpack.c.bf16 %v1022_v40, %v1021_v38  ;;  %v1387_v45 = vmax.f32 %v1244_v41, 0.0  ;;  %v568_v46 = vadd.f32 %v2644_v33, %v567_v42  ;;  %v2897_v40 = vld [vmem:[%s3271_s2] ss:$0 sm:$0xff] }
 0x216   : > { %v657_v48 = vmax.f32 %v568_v46, 0.0  ;;  %2303 = vmatmul.msk.bf16.gmra.mxu2 %vm344_vm0, %v1078_v44  ;;  %v1452_v49 = vpack.c.bf16 %v1387_v45, %v1386_v43 }
 0x217   : > { %v908_v50 = vpop.f32.mrf.mxu1 }
 0x218   : > { %v704_v51 = vpack.c.bf16 %v657_v48, %v656_v47  ;;  %2339 = vmatmul.msk.bf16.gmra.mxu3 %vm344_vm0, %v1452_v49  ;;  %v909_v54 = vadd.f32 %v2708_v62, %v908_v50 }
 0x219   : > { %v1246_v52 = vpop.f32.mrf.mxu2 }
 0x21a   : > { %2267 = vmatmul.msk.bf16.gmra.mxu1 %vm344_vm0, %v704_v51  ;;  %v1247_v56 = vadd.f32 %v2801_v34, %v1246_v52  ;;  %v1023_v59 = vmax.f32 %v909_v54, 0.0 }
 0x21b   : > { %v570_v53 = vpop.f32.mrf.mxu0 }
 0x21c   : > { %v571_v60 = vadd.f32 %v2644_v33, %v570_v53  ;;  %v1388_v1 = vmax.f32 %v1247_v56, 0.0 }
 0x21e   : > { %v658_v5 = vmax.f32 %v571_v60, 0.0 }
 0x21f   : > { %v910_v55 = vpop.f32.mrf.mxu1 }
 0x220   : > { %v911_v57 = vadd.f32 %v2708_v62, %v910_v55 }
 0x221   : > { %v1248_v58 = vpop.f32.mrf.mxu2 }
 0x222   : > { %v1024_v61 = vmax.f32 %v911_v57, 0.0  ;;  %v1249_v63 = vadd.f32 %v2801_v34, %v1248_v58  ;;  %v2909_v58 = vld [vmem:[%s3271_s2 + $0x3] ss:$0 sm:$0xff] }
 0x223   : > { %v572_v0 = vpop.f32.mrf.mxu0 }
 0x224   : > { %v1079_v2 = vpack.c.bf16 %v1024_v61, %v1023_v59  ;;  %v1389_v3 = vmax.f32 %v1249_v63, 0.0  ;;  %v573_v4 = vadd.f32 %v2644_v33, %v572_v0 }
 0x226   : > { %v659_v6 = vmax.f32 %v573_v4, 0.0  ;;  %2304 = vmatmul.msk.bf16.gmra.mxu2 %vm344_vm0, %v1079_v2  ;;  %v1453_v7 = vpack.c.bf16 %v1389_v3, %v1388_v1 }
 0x227   : > { %v913_v8 = vpop.f32.mrf.mxu1 }
 0x228   : > { %v705_v9 = vpack.c.bf16 %v659_v6, %v658_v5  ;;  %2340 = vmatmul.msk.bf16.gmra.mxu3 %vm344_vm0, %v1453_v7  ;;  %v914_v12 = vadd.f32 %v2708_v62, %v913_v8 }
 0x229   : > { %v1251_v10 = vpop.f32.mrf.mxu2 }
 0x22a   : > { %2268 = vmatmul.msk.bf16.gmra.mxu1 %vm344_vm0, %v705_v9  ;;  %v1252_v14 = vadd.f32 %v2801_v34, %v1251_v10  ;;  %v1025_v17 = vmax.f32 %v914_v12, 0.0 }
 0x22b   : > { %v575_v11 = vpop.f32.mrf.mxu0 }
 0x22c   : > { %v576_v18 = vadd.f32 %v2644_v33, %v575_v11  ;;  %v1390_v22 = vmax.f32 %v1252_v14, 0.0 }
 0x22e   : > { %v660_v26 = vmax.f32 %v576_v18, 0.0 }
 0x22f   : > { %v915_v13 = vpop.f32.mrf.mxu1 }
 0x230   : > { %v916_v15 = vadd.f32 %v2708_v62, %v915_v13 }
 0x231   : > { %v1253_v16 = vpop.f32.mrf.mxu2 }
 0x232   : > { %v1026_v19 = vmax.f32 %v916_v15, 0.0  ;;  %v1254_v20 = vadd.f32 %v2801_v34, %v1253_v16 }
 0x233   : > { %v577_v21 = vpop.f32.mrf.mxu0 }
 0x234   : > { %v1080_v23 = vpack.c.bf16 %v1026_v19, %v1025_v17  ;;  %v1391_v24 = vmax.f32 %v1254_v20, 0.0  ;;  %v578_v25 = vadd.f32 %v2644_v33, %v577_v21 }
 0x236   : > { %v661_v27 = vmax.f32 %v578_v25, 0.0  ;;  %2305 = vmatmul.msk.bf16.gmra.mxu2 %vm344_vm0, %v1080_v23  ;;  %v1454_v28 = vpack.c.bf16 %v1391_v24, %v1390_v22 }
 0x237   : > { %v918_v29 = vpop.f32.mrf.mxu1 }
 0x238   : > { %v706_v30 = vpack.c.bf16 %v661_v27, %v660_v26  ;;  %2341 = vmatmul.msk.bf16.gmra.mxu3 %vm344_vm0, %v1454_v28  ;;  %v919_v35 = vadd.f32 %v2708_v62, %v918_v29 }
 0x239   : > { %v1256_v31 = vpop.f32.mrf.mxu2 }
 0x23a   : > { %2269 = vmatmul.msk.bf16.gmra.mxu1 %vm344_vm0, %v706_v30  ;;  %v1257_v37 = vadd.f32 %v2801_v34, %v1256_v31  ;;  %v1027_v39 = vmax.f32 %v919_v35, 0.0 }
 0x23b   : > { %v580_v32 = vpop.f32.mrf.mxu0 }
 0x23c   : > { %v581_v41 = vadd.f32 %v2897_v40, %v580_v32  ;;  %v1392_v45 = vmax.f32 %v1257_v37, 0.0 }
 0x23e   : > { %v662_v49 = vmax.f32 %v581_v41, 0.0 }
 0x23f   : > { %v920_v36 = vpop.f32.mrf.mxu1 }
 0x240   : > { %v921_v33 = vadd.f32 %v2708_v62, %v920_v36 }
 0x241   : > { %v1258_v38 = vpop.f32.mrf.mxu2 }
 0x242   : > { %v1028_v42 = vmax.f32 %v921_v33, 0.0  ;;  %v1259_v43 = vadd.f32 %v2801_v34, %v1258_v38 }
 0x243   : > { %v582_v44 = vpop.f32.mrf.mxu0 }
 0x244   : > { %v1081_v46 = vpack.c.bf16 %v1028_v42, %v1027_v39  ;;  %v1393_v47 = vmax.f32 %v1259_v43, 0.0  ;;  %v583_v48 = vadd.f32 %v2897_v40, %v582_v44 }
 0x246   : > { %v663_v50 = vmax.f32 %v583_v48, 0.0  ;;  %2306 = vmatmul.msk.bf16.gmra.mxu2 %vm344_vm0, %v1081_v46  ;;  %v1455_v51 = vpack.c.bf16 %v1393_v47, %v1392_v45 }
 0x247   : > { %v923_v52 = vpop.f32.mrf.mxu1 }
 0x248   : > { %v707_v53 = vpack.c.bf16 %v663_v50, %v662_v49  ;;  %2342 = vmatmul.msk.bf16.gmra.mxu3 %vm344_vm0, %v1455_v51  ;;  %v924_v57 = vadd.f32 %v2708_v62, %v923_v52 }
 0x249   : > { %v1261_v54 = vpop.f32.mrf.mxu2 }
 0x24a   : > { %2270 = vmatmul.msk.bf16.gmra.mxu1 %vm344_vm0, %v707_v53  ;;  %v1262_v59 = vadd.f32 %v2801_v34, %v1261_v54  ;;  %v1029_v1 = vmax.f32 %v924_v57, 0.0 }
 0x24b   : > { %v585_v55 = vpop.f32.mrf.mxu0  ;;  %v1599_v56 = vpop.f32.mrf.mxu3 }
 0x24c   : > { %v586_v63 = vadd.f32 %v2897_v40, %v585_v55  ;;  %v1600_v2 = vadd.f32 %v2909_v58, %v1599_v56  ;;  %v1394_v5 = vmax.f32 %v1262_v59, 0.0 }
 0x24e   : > { %v664_v12 = vmax.f32 %v586_v63, 0.0  ;;  %v1759_v13 = vmax.f32 %v1600_v2, 0.0 }
 0x24f   : > { %v925_v60 = vpop.f32.mrf.mxu1 }
 0x250   : > { %v926_v61 = vadd.f32 %v2708_v62, %v925_v60 }
 0x251   : > { %v1263_v0 = vpop.f32.mrf.mxu2 }
 0x252   : > { %v1030_v3 = vmax.f32 %v926_v61, 0.0  ;;  %v1264_v4 = vadd.f32 %v2801_v34, %v1263_v0 }
 0x253   : > { %v587_v6 = vpop.f32.mrf.mxu0  ;;  %v1601_v7 = vpop.f32.mrf.mxu3 }
 0x254   : > { %v1082_v8 = vpack.c.bf16 %v1030_v3, %v1029_v1  ;;  %v1395_v9 = vmax.f32 %v1264_v4, 0.0  ;;  %v588_v10 = vadd.f32 %v2897_v40, %v587_v6  ;;  %v1602_v11 = vadd.f32 %v2909_v58, %v1601_v7 }
 0x256   : > { %v665_v14 = vmax.f32 %v588_v10, 0.0  ;;  %v1760_v15 = vmax.f32 %v1602_v11, 0.0  ;;  %2307 = vmatmul.msk.bf16.gmra.mxu2 %vm344_vm0, %v1082_v8  ;;  %v1456_v16 = vpack.c.bf16 %v1395_v9, %v1394_v5 }
 0x257   : > { %v928_v17 = vpop.f32.mrf.mxu1 }
 0x258   : > { %v708_v18 = vpack.c.bf16 %v665_v14, %v664_v12  ;;  %2343 = vmatmul.msk.bf16.gmra.mxu3 %vm344_vm0, %v1456_v16  ;;  %v2920_v19 = vpack.c.bf16 %v1760_v15, %v1759_v13  ;;  %v929_v23 = vadd.f32 %v2708_v62, %v928_v17 }
 0x259   : > { %v1266_v20 = vpop.f32.mrf.mxu2 }
 0x25a   : > { %2271 = vmatmul.msk.bf16.gmra.mxu1 %vm344_vm0, %v708_v18  ;;  %v1267_v24 = vadd.f32 %v2801_v34, %v1266_v20  ;;  %v1031_v29 = vmax.f32 %v929_v23, 0.0  ;;  %v2952_v18 = vld [vmem:[%s3271_s2 + $0x1] ss:$0 sm:$0xff] }
 0x25b   : > { %v590_v21 = vpop.f32.mrf.mxu0  ;;  %v1604_v22 = vpop.f32.mrf.mxu3 }
 0x25c   : > { %v591_v27 = vadd.f32 %v2897_v40, %v590_v21  ;;  %v1605_v30 = vadd.f32 %v2909_v58, %v1604_v22  ;;  %v1396_v35 = vmax.f32 %v1267_v24, 0.0 }
 0x25e   : > { %v666_v42 = vmax.f32 %v591_v27, 0.0  ;;  %v1761_v43 = vmax.f32 %v1605_v30, 0.0 }
 0x25f   : > { %v930_v25 = vpop.f32.mrf.mxu1 }
 0x260   : > { %v931_v26 = vadd.f32 %v2708_v62, %v930_v25 }
 0x261   : > { %v1268_v28 = vpop.f32.mrf.mxu2 }
 0x262   : > { %v1032_v31 = vmax.f32 %v931_v26, 0.0  ;;  %v1269_v32 = vadd.f32 %v2801_v34, %v1268_v28 }
 0x263   : > { %v592_v36 = vpop.f32.mrf.mxu0  ;;  %v1606_v37 = vpop.f32.mrf.mxu3 }
 0x264   : > { %v1083_v33 = vpack.c.bf16 %v1032_v31, %v1031_v29  ;;  %v1397_v38 = vmax.f32 %v1269_v32, 0.0  ;;  %v593_v39 = vadd.f32 %v2897_v40, %v592_v36  ;;  %v1607_v41 = vadd.f32 %v2909_v58, %v1606_v37 }
 0x266   : > { %v667_v44 = vmax.f32 %v593_v39, 0.0  ;;  %v1762_v45 = vmax.f32 %v1607_v41, 0.0  ;;  %2308 = vmatmul.msk.bf16.gmra.mxu2 %vm344_vm0, %v1083_v33  ;;  %v1457_v46 = vpack.c.bf16 %v1397_v38, %v1396_v35 }
 0x267   : > { %v933_v47 = vpop.f32.mrf.mxu1 }
 0x268   : > { %v709_v48 = vpack.c.bf16 %v667_v44, %v666_v42  ;;  %2344 = vmatmul.msk.bf16.gmra.mxu3 %vm344_vm0, %v1457_v46  ;;  %v2933_v49 = vpack.c.bf16 %v1762_v45, %v1761_v43  ;;  %v934_v53 = vadd.f32 %v2708_v62, %v933_v47 }
 0x269   : > { %v1271_v50 = vpop.f32.mrf.mxu2 }
 0x26a   : > { %2272 = vmatmul.msk.bf16.gmra.mxu1 %vm344_vm0, %v709_v48  ;;  %v1272_v54 = vadd.f32 %v2801_v34, %v1271_v50  ;;  %v1033_v60 = vmax.f32 %v934_v53, 0.0 }
 0x26b   : > { %v595_v51 = vpop.f32.mrf.mxu0  ;;  %v1609_v52 = vpop.f32.mrf.mxu3 }
 0x26c   : > { %v596_v57 = vadd.f32 %v2897_v40, %v595_v51  ;;  %v1610_v61 = vadd.f32 %v2909_v58, %v1609_v52  ;;  %v1398_v1 = vmax.f32 %v1272_v54, 0.0 }
 0x26e   : > { %v668_v8 = vmax.f32 %v596_v57, 0.0 }
 0x26f   : > { %v935_v55 = vpop.f32.mrf.mxu1 }
 0x270   : > { %v936_v56 = vadd.f32 %v2708_v62, %v935_v55  ;;  %v1763_v62 = vmax.f32 %v1610_v61, 0.0 }
 0x271   : > { %v1273_v59 = vpop.f32.mrf.mxu2 }
 0x272   : > { %v1034_v63 = vmax.f32 %v936_v56, 0.0  ;;  %v1274_v0 = vadd.f32 %v2801_v34, %v1273_v59 }
 0x273   : > { %v597_v2 = vpop.f32.mrf.mxu0  ;;  %v1611_v3 = vpop.f32.mrf.mxu3 }
 0x274   : > { %v1084_v4 = vpack.c.bf16 %v1034_v63, %v1033_v60  ;;  %v1399_v5 = vmax.f32 %v1274_v0, 0.0  ;;  %v598_v6 = vadd.f32 %v2897_v40, %v597_v2  ;;  %v1612_v7 = vadd.f32 %v2909_v58, %v1611_v3 }
 0x276   : > { %v669_v9 = vmax.f32 %v598_v6, 0.0  ;;  %v1764_v10 = vmax.f32 %v1612_v7, 0.0  ;;  %2309 = vmatmul.msk.bf16.gmra.mxu2 %vm344_vm0, %v1084_v4  ;;  %v1458_v11 = vpack.c.bf16 %v1399_v5, %v1398_v1 }
 0x277   : > { %v938_v12 = vpop.f32.mrf.mxu1 }
 0x278   : > { %v710_v13 = vpack.c.bf16 %v669_v9, %v668_v8  ;;  %2345 = vmatmul.msk.bf16.gmra.mxu3 %vm344_vm0, %v1458_v11  ;;  %v2946_v14 = vpack.c.bf16 %v1764_v10, %v1763_v62  ;;  %v939_v20 = vadd.f32 %v2952_v18, %v938_v12 }
 0x279   : > { %v1276_v15 = vpop.f32.mrf.mxu2 }
 0x27a   : > { %2273 = vmatmul.msk.bf16.gmra.mxu1 %vm344_vm0, %v710_v13  ;;  %v1277_v21 = vadd.f32 %v2801_v34, %v1276_v15  ;;  %v1035_v26 = vmax.f32 %v939_v20, 0.0 }
 0x27b   : > { %v600_v16 = vpop.f32.mrf.mxu0  ;;  %v1614_v17 = vpop.f32.mrf.mxu3 }
 0x27c   : > { %v601_v24 = vadd.f32 %v2897_v40, %v600_v16  ;;  %v1615_v27 = vadd.f32 %v2909_v58, %v1614_v17  ;;  %v1400_v30 = vmax.f32 %v1277_v21, 0.0 }
 0x27e   : > { %v670_v38 = vmax.f32 %v601_v24, 0.0  ;;  %v1765_v39 = vmax.f32 %v1615_v27, 0.0 }
 0x27f   : > { %v940_v22 = vpop.f32.mrf.mxu1 }
 0x280   : > { %v941_v23 = vadd.f32 %v2952_v18, %v940_v22 }
 0x281   : > { %v1278_v25 = vpop.f32.mrf.mxu2 }
 0x282   : > { %v1036_v28 = vmax.f32 %v941_v23, 0.0  ;;  %v1279_v29 = vadd.f32 %v2801_v34, %v1278_v25 }
 0x283   : > { %v602_v31 = vpop.f32.mrf.mxu0  ;;  %v1616_v32 = vpop.f32.mrf.mxu3 }
 0x284   : > { %v1085_v35 = vpack.c.bf16 %v1036_v28, %v1035_v26  ;;  %v1401_v36 = vmax.f32 %v1279_v29, 0.0  ;;  %v603_v37 = vadd.f32 %v2897_v40, %v602_v31  ;;  %v1617_v33 = vadd.f32 %v2909_v58, %v1616_v32 }
 0x286   : > { %v1459_v41 = vpack.c.bf16 %v1401_v36, %v1400_v30  ;;  %v671_v42 = vmax.f32 %v603_v37, 0.0  ;;  %v1766_v43 = vmax.f32 %v1617_v33, 0.0  ;;  %2310 = vmatmul.msk.bf16.gmra.mxu2 %vm344_vm0, %v1085_v35 }
 0x287   : > { %v943_v44 = vpop.f32.mrf.mxu1 }
 0x288   : > { %v711_v45 = vpack.c.bf16 %v671_v42, %v670_v38  ;;  %2346 = vmatmul.msk.bf16.gmra.mxu3 %vm344_vm0, %v1459_v41  ;;  %v2964_v46 = vpack.c.bf16 %v1766_v43, %v1765_v39  ;;  %v944_v51 = vadd.f32 %v2952_v18, %v943_v44 }
 0x289   : > { %v1281_v47 = vpop.f32.mrf.mxu2 }
 0x28a   : > { %2274 = vmatmul.msk.bf16.gmra.mxu1 %vm344_vm0, %v711_v45  ;;  %v1282_v52 = vadd.f32 %v2801_v34, %v1281_v47  ;;  %v1037_v57 = vmax.f32 %v944_v51, 0.0 }
 0x28b   : > { %v605_v48 = vpop.f32.mrf.mxu0  ;;  %v1619_v50 = vpop.f32.mrf.mxu3 }
 0x28c   : > { %v606_v55 = vadd.f32 %v2897_v40, %v605_v48  ;;  %v1620_v59 = vadd.f32 %v2909_v58, %v1619_v50  ;;  %v1402_v63 = vmax.f32 %v1282_v52, 0.0 }
 0x28e   : > { %v672_v6 = vmax.f32 %v606_v55, 0.0  ;;  %v1767_v7 = vmax.f32 %v1620_v59, 0.0 }
 0x28f   : > { %v945_v53 = vpop.f32.mrf.mxu1 }
 0x290   : > { %v946_v54 = vadd.f32 %v2952_v18, %v945_v53 }
 0x291   : > { %v1283_v56 = vpop.f32.mrf.mxu2 }
 0x292   : > { %v1038_v60 = vmax.f32 %v946_v54, 0.0  ;;  %v1284_v61 = vadd.f32 %v2801_v34, %v1283_v56 }
 0x293   : > { %v607_v0 = vpop.f32.mrf.mxu0  ;;  %v1621_v1 = vpop.f32.mrf.mxu3 }
 0x294   : > { %v1086_v2 = vpack.c.bf16 %v1038_v60, %v1037_v57  ;;  %v1403_v3 = vmax.f32 %v1284_v61, 0.0  ;;  %v608_v4 = vadd.f32 %v2897_v40, %v607_v0  ;;  %v1622_v5 = vadd.f32 %v2909_v58, %v1621_v1 }
 0x296   : > { %v1460_v8 = vpack.c.bf16 %v1403_v3, %v1402_v63  ;;  %v673_v62 = vmax.f32 %v608_v4, 0.0  ;;  %v1768_v9 = vmax.f32 %v1622_v5, 0.0  ;;  %2311 = vmatmul.msk.bf16.gmra.mxu2 %vm344_vm0, %v1086_v2 }
 0x297   : > { %v948_v10 = vpop.f32.mrf.mxu1 }
 0x298   : > { %v712_v11 = vpack.c.bf16 %v673_v62, %v672_v6  ;;  %2347 = vmatmul.msk.bf16.gmra.mxu3 %vm344_vm0, %v1460_v8  ;;  %v2977_v12 = vpack.c.bf16 %v1768_v9, %v1767_v7  ;;  %v949_v40 = vadd.f32 %v2952_v18, %v948_v10 }
 0x299   : > { %v1286_v13 = vpop.f32.mrf.mxu2 }
 0x29a   : > { %2275 = vmatmul.msk.bf16.gmra.mxu1 %vm344_vm0, %v712_v11  ;;  %v1287_v17 = vadd.f32 %v2801_v34, %v1286_v13  ;;  %v1039_v22 = vmax.f32 %v949_v40, 0.0 }
 0x29b   : > { %v2980_v15 = vpop.f32.mrf.mxu3 }
 0x29c   : > { %v1404_v26 = vmax.f32 %v1287_v17, 0.0 }
 0x29f   : > { %v950_v16 = vpop.f32.mrf.mxu1 }
 0x2a0   : > { %v951_v20 = vadd.f32 %v2952_v18, %v950_v16 }
 0x2a1   : > { %v1288_v21 = vpop.f32.mrf.mxu2 }
 0x2a2   : > { %v1040_v23 = vmax.f32 %v951_v20, 0.0  ;;  %v1289_v24 = vadd.f32 %v2801_v34, %v1288_v21 }
 0x2a3   : > { %v1626_v25 = vpop.f32.mrf.mxu3 }
 0x2a4   : > { %v1087_v27 = vpack.c.bf16 %v1040_v23, %v1039_v22  ;;  %v1405_v28 = vmax.f32 %v1289_v24, 0.0  ;;  %v1627_v20 = vadd.f32 %v2909_v58, %v1626_v25  ;;  %v1625_v23 = vadd.f32 %v2909_v58, %v2980_v15 }
 0x2a6   : > { %v1461_v29 = vpack.c.bf16 %v1405_v28, %v1404_v26  ;;  %2312 = vmatmul.msk.bf16.gmra.mxu2 %vm344_vm0, %v1087_v27  ;;  %v1770_v28 = vmax.f32 %v1627_v20, 0.0  ;;  %v1873_v20 = vsel %vm344_vm0, %v2946_v14, 0 }
 0x2a7   : > { %v953_v30 = vpop.f32.mrf.mxu1 }
 0x2a8   : > { %2348 = vmatmul.msk.bf16.gmra.mxu3 %vm344_vm0, %v1461_v29  ;;  %v954_v35 = vadd.f32 %v2952_v18, %v953_v30 }
 0x2a9   : > { %v1291_v31 = vpop.f32.mrf.mxu2 }
 0x2aa   : > { %v1292_v37 = vadd.f32 %v2801_v34, %v1291_v31  ;;  %v1041_v39 = vmax.f32 %v954_v35, 0.0 }
 0x2ab   : > { %v1629_v32 = vpop.f32.mrf.mxu3 }
 0x2ac   : > { %v1406_v44 = vmax.f32 %v1292_v37, 0.0  ;;  %v1630_v62 = vadd.f32 %v2909_v58, %v1629_v32 }
 0x2ae   : > { %v1771_v16 = vmax.f32 %v1630_v62, 0.0 }
 0x2af   : > { %v955_v36 = vpop.f32.mrf.mxu1 }
 0x2b0   : > { %v956_v33 = vadd.f32 %v2952_v18, %v955_v36  ;;  %v1769_v36 = vmax.f32 %v1625_v23, 0.0 }
 0x2b1   : > { %v1293_v38 = vpop.f32.mrf.mxu2 }
 0x2b2   : > { %v1042_v41 = vmax.f32 %v956_v33, 0.0  ;;  %v1294_v42 = vadd.f32 %v2801_v34, %v1293_v38 }
 0x2b3   : > { %v1631_v43 = vpop.f32.mrf.mxu3 }
 0x2b4   : > { %v1088_v45 = vpack.c.bf16 %v1042_v41, %v1041_v39  ;;  %v1407_v47 = vmax.f32 %v1294_v42, 0.0  ;;  %v1632_v5 = vadd.f32 %v2909_v58, %v1631_v43 }
 0x2b6   : > { %v1462_v48 = vpack.c.bf16 %v1407_v47, %v1406_v44  ;;  %2313 = vmatmul.msk.bf16.gmra.mxu2 %vm344_vm0, %v1088_v45  ;;  %v1772_v11 = vmax.f32 %v1632_v5, 0.0  ;;  %v1829_v44 = vpack.c.bf16 %v1770_v28, %v1769_v36  ;;  %v1870_v36 = vsel %vm344_vm0, %v2933_v49, 0 }
 0x2b7   : > { %v958_v50 = vpop.f32.mrf.mxu1 }
 0x2b8   : > { %2349 = vmatmul.msk.bf16.gmra.mxu3 %vm344_vm0, %v1462_v48  ;;  %v959_v53 = vadd.f32 %v2952_v18, %v958_v50  ;;  %v1830_v21 = vpack.c.bf16 %v1772_v11, %v1771_v16  ;;  %v1882_v50 = vsel %vm344_vm0, %v1829_v44, 0 }
 0x2b9   : > { %v1296_v51 = vpop.f32.mrf.mxu2 }
 0x2ba   : > { %v1297_v55 = vadd.f32 %v2801_v34, %v1296_v51  ;;  %v1043_v59 = vmax.f32 %v959_v53, 0.0  ;;  %v1885_v30 = vsel %vm344_vm0, %v1830_v21, 0 }
 0x2bb   : > { %v1634_v52 = vpop.f32.mrf.mxu3 }
 0x2bc   : > { %v1635_v60 = vadd.f32 %v2909_v58, %v1634_v52  ;;  %v1408_v1 = vmax.f32 %v1297_v55, 0.0 }
 0x2be   : > { %v1773_v6 = vmax.f32 %v1635_v60, 0.0 }
 0x2bf   : > { %v960_v54 = vpop.f32.mrf.mxu1 }
 0x2c0   : > { %v961_v56 = vadd.f32 %v2952_v18, %v960_v54 }
 0x2c1   : > { %v1298_v57 = vpop.f32.mrf.mxu2 }
 0x2c2   : > { %v1044_v61 = vmax.f32 %v961_v56, 0.0  ;;  %v1299_v63 = vadd.f32 %v2801_v34, %v1298_v57  ;;  %v1879_v57 = vsel %vm344_vm0, %v2977_v12, 0 }
 0x2c3   : > { %v1636_v0 = vpop.f32.mrf.mxu3 }
 0x2c4   : > { %v1089_v2 = vpack.c.bf16 %v1044_v61, %v1043_v59  ;;  %v1409_v3 = vmax.f32 %v1299_v63, 0.0  ;;  %v1637_v4 = vadd.f32 %v2909_v58, %v1636_v0 }
 0x2c6   : > { %v1463_v7 = vpack.c.bf16 %v1409_v3, %v1408_v1  ;;  %v1774_v8 = vmax.f32 %v1637_v4, 0.0  ;;  %2314 = vmatmul.msk.bf16.gmra.mxu2 %vm344_vm0, %v1089_v2 }
 0x2c7   : > { %v963_v9 = vpop.f32.mrf.mxu1 }
 0x2c8   : > { %2350 = vmatmul.msk.bf16.gmra.mxu3 %vm344_vm0, %v1463_v7  ;;  %v1831_v10 = vpack.c.bf16 %v1774_v8, %v1773_v6  ;;  %v964_v22 = vadd.f32 %v2952_v18, %v963_v9 }
 0x2c9   : > { %v1301_v13 = vpop.f32.mrf.mxu2 }
 0x2ca   : > { %v1888_v40 = vsel %vm344_vm0, %v1831_v10, 0  ;;  %v1302_v26 = vadd.f32 %v2801_v34, %v1301_v13  ;;  %v1045_v31 = vmax.f32 %v964_v22, 0.0  ;;  %v3038_v13 = vld [vmem:[%s3271_s2 + $0x2] ss:$0 sm:$0xff] }
 0x2cb   : > { %v1639_v17 = vpop.f32.mrf.mxu3  ;;  %1962 = vmatpush.bf16.xpose.msrb.mxu0 %v1888_v40 }
 0x2cc   : > { %v1640_v32 = vadd.f32 %v2909_v58, %v1639_v17  ;;  %v1410_v33 = vmax.f32 %v1302_v26, 0.0 }
 0x2ce   : > { %v1775_v41 = vmax.f32 %v1640_v32, 0.0 }
 0x2cf   : > { %v965_v24 = vpop.f32.mrf.mxu1 }
 0x2d0   : > { %v966_v27 = vadd.f32 %v2952_v18, %v965_v24 }
 0x2d1   : > { %v1303_v29 = vpop.f32.mrf.mxu2 }
 0x2d2   : > { %v1046_v35 = vmax.f32 %v966_v27, 0.0  ;;  %v1304_v25 = vadd.f32 %v2801_v34, %v1303_v29 }
 0x2d3   : > { %v1641_v37 = vpop.f32.mrf.mxu3  ;;  %1963 = vmatpush.bf16.xpose.msrb.mxu0 %v1885_v30 }
 0x2d4   : > { %v1090_v15 = vpack.c.bf16 %v1046_v35, %v1045_v31  ;;  %v1411_v38 = vmax.f32 %v1304_v25, 0.0  ;;  %v1642_v39 = vadd.f32 %v2909_v58, %v1641_v37 }
 0x2d6   : > { %v1464_v42 = vpack.c.bf16 %v1411_v38, %v1410_v33  ;;  %v1776_v43 = vmax.f32 %v1642_v39, 0.0  ;;  %2315 = vmatmul.msk.bf16.gmra.mxu2 %vm344_vm0, %v1090_v15 }
 0x2d7   : > { %v968_v45 = vpop.f32.mrf.mxu1 }
 0x2d8   : > { %2351 = vmatmul.msk.bf16.gmra.mxu3 %vm344_vm0, %v1464_v42  ;;  %v3017_v47 = vpack.c.bf16 %v1776_v43, %v1775_v41  ;;  %v969_v52 = vadd.f32 %v2952_v18, %v968_v45  ;;  %v1867_v42 = vsel %vm344_vm0, %v2920_v19, 0 }
 0x2d9   : > { %v1306_v48 = vpop.f32.mrf.mxu2 }
 0x2da   : > { %v1307_v54 = vadd.f32 %v2801_v34, %v1306_v48  ;;  %v1047_v59 = vmax.f32 %v969_v52, 0.0 }
 0x2db   : > { %v1644_v51 = vpop.f32.mrf.mxu3  ;;  %1964 = vmatpush.bf16.xpose.msrb.mxu0 %v1882_v50 }
 0x2dc   : > { %v1645_v60 = vadd.f32 %v2909_v58, %v1644_v51  ;;  %v1412_v1 = vmax.f32 %v1307_v54, 0.0 }
 0x2de   : > { %v1777_v5 = vmax.f32 %v1645_v60, 0.0 }
 0x2df   : > { %v970_v53 = vpop.f32.mrf.mxu1 }
 0x2e0   : > { %v971_v55 = vadd.f32 %v2952_v18, %v970_v53 }
 0x2e1   : > { %v1308_v56 = vpop.f32.mrf.mxu2 }
 0x2e2   : > { %v1048_v61 = vmax.f32 %v971_v55, 0.0  ;;  %v1309_v63 = vadd.f32 %v2801_v34, %v1308_v56  ;;  %v1876_v34 = vsel %vm344_vm0, %v2964_v46, 0 }
 0x2e3   : > { %v1646_v0 = vpop.f32.mrf.mxu3  ;;  %1965 = vmatpush.bf16.xpose.msrb.mxu0 %v1879_v57 }
 0x2e4   : > { %v1091_v2 = vpack.c.bf16 %v1048_v61, %v1047_v59  ;;  %v1413_v3 = vmax.f32 %v1309_v63, 0.0  ;;  %v1647_v4 = vadd.f32 %v2909_v58, %v1646_v0 }
 0x2e6   : > { %v1465_v6 = vpack.c.bf16 %v1413_v3, %v1412_v1  ;;  %v1778_v7 = vmax.f32 %v1647_v4, 0.0  ;;  %2316 = vmatmul.msk.bf16.gmra.mxu2 %vm344_vm0, %v1091_v2 }
 0x2e7   : > { %v973_v8 = vpop.f32.mrf.mxu1 }
 0x2e8   : > { %2352 = vmatmul.msk.bf16.gmra.mxu3 %vm344_vm0, %v1465_v6  ;;  %v3030_v12 = vpack.c.bf16 %v1778_v7, %v1777_v5  ;;  %v974_v10 = vadd.f32 %v2952_v18, %v973_v8 }
 0x2e9   : > { %v1311_v62 = vpop.f32.mrf.mxu2 }
 0x2ea   : > { %v1312_v40 = vadd.f32 %v3038_v13, %v1311_v62  ;;  %v1049_v21 = vmax.f32 %v974_v10, 0.0 }
 0x2eb   : > { %v1649_v9 = vpop.f32.mrf.mxu3  ;;  %1966 = vmatpush.bf16.xpose.msrb.mxu0 %v1876_v34 }
 0x2ec   : > { %v1650_v46 = vadd.f32 %v2909_v58, %v1649_v9  ;;  %v1414_v26 = vmax.f32 %v1312_v40, 0.0 }
 0x2ee   : > { %v1779_v30 = vmax.f32 %v1650_v46, 0.0 }
 0x2ef   : > { %v975_v11 = vpop.f32.mrf.mxu1 }
 0x2f0   : > { %v976_v16 = vadd.f32 %v2952_v18, %v975_v11 }
 0x2f1   : > { %v1313_v17 = vpop.f32.mrf.mxu2 }
 0x2f2   : > { %v1050_v22 = vmax.f32 %v976_v16, 0.0  ;;  %v1314_v23 = vadd.f32 %v3038_v13, %v1313_v17 }
 0x2f3   : > { %v1651_v24 = vpop.f32.mrf.mxu3  ;;  %1967 = vmatpush.bf16.xpose.msrb.mxu0 %v1873_v20 }
 0x2f4   : > { %v1092_v27 = vpack.c.bf16 %v1050_v22, %v1049_v21  ;;  %v1415_v28 = vmax.f32 %v1314_v23, 0.0  ;;  %v1652_v29 = vadd.f32 %v2909_v58, %v1651_v24 }
 0x2f6   : > { %v1466_v31 = vpack.c.bf16 %v1415_v28, %v1414_v26  ;;  %v1780_v32 = vmax.f32 %v1652_v29, 0.0  ;;  %2317 = vmatmul.msk.bf16.gmra.mxu2 %vm344_vm0, %v1092_v27 }
 0x2f7   : > { %v978_v35 = vpop.f32.mrf.mxu1 }
 0x2f8   : > { %2353 = vmatmul.msk.bf16.gmra.mxu3 %vm344_vm0, %v1466_v31  ;;  %v3049_v14 = vpack.c.bf16 %v1780_v32, %v1779_v30  ;;  %v979_v33 = vadd.f32 %v2952_v18, %v978_v35 }
 0x2f9   : > { %v1316_v25 = vpop.f32.mrf.mxu2 }
 0x2fa   : > { %v1317_v38 = vadd.f32 %v3038_v13, %v1316_v25  ;;  %v1051_v43 = vmax.f32 %v979_v33, 0.0 }
 0x2fb   : > { %v1654_v37 = vpop.f32.mrf.mxu3  ;;  %1968 = vmatpush.bf16.xpose.msrb.mxu0 %v1870_v36 }
 0x2fc   : > { %v1655_v44 = vadd.f32 %v2909_v58, %v1654_v37  ;;  %v1416_v50 = vmax.f32 %v1317_v38, 0.0 }
 0x2fe   : > { %v1781_v54 = vmax.f32 %v1655_v44, 0.0 }
 0x2ff   : > { %v980_v15 = vpop.f32.mrf.mxu1 }
 0x300   : > { %v981_v39 = vadd.f32 %v2952_v18, %v980_v15 }
 0x301   : > { %v1318_v41 = vpop.f32.mrf.mxu2 }
 0x302   : > { %v1052_v45 = vmax.f32 %v981_v39, 0.0  ;;  %v1319_v48 = vadd.f32 %v3038_v13, %v1318_v41 }
 0x303   : > { %v1656_v49 = vpop.f32.mrf.mxu3  ;;  %1969 = vmatpush.bf16.xpose.msrb.mxu0 %v1867_v42 }
 0x304   : > { %v1093_v51 = vpack.c.bf16 %v1052_v45, %v1051_v43  ;;  %v1417_v52 = vmax.f32 %v1319_v48, 0.0  ;;  %v1657_v53 = vadd.f32 %v2909_v58, %v1656_v49 }
 0x306   : > { %v1467_v55 = vpack.c.bf16 %v1417_v52, %v1416_v50  ;;  %v1782_v56 = vmax.f32 %v1657_v53, 0.0  ;;  %2318 = vmatmul.msk.bf16.gmra.mxu2 %vm344_vm0, %v1093_v51 }
 0x307   : > { %v983_v57 = vpop.f32.mrf.mxu1 }
 0x308   : > { %2354 = vmatmul.msk.bf16.gmra.mxu3 %vm344_vm0, %v1467_v55  ;;  %v3063_v19 = vpack.c.bf16 %v1782_v56, %v1781_v54  ;;  %v984_v61 = vadd.f32 %v2952_v18, %v983_v57 }
 0x309   : > { %v1321_v59 = vpop.f32.mrf.mxu2 }
 0x30a   : > { %v1322_v0 = vadd.f32 %v3038_v13, %v1321_v59  ;;  %v1053_v3 = vmax.f32 %v984_v61, 0.0 }
 0x30b   : > { %v1659_v60 = vpop.f32.mrf.mxu3 }
 0x30c   : > { %v1660_v4 = vadd.f32 %v2909_v58, %v1659_v60  ;;  %v1418_v8 = vmax.f32 %v1322_v0, 0.0 }
 0x30e   : > { %v1783_v10 = vmax.f32 %v1660_v4, 0.0 }
 0x30f   : > { %v985_v63 = vpop.f32.mrf.mxu1 }
 0x310   : > { %v986_v1 = vadd.f32 %v2952_v18, %v985_v63 }
 0x311   : > { %v1323_v2 = vpop.f32.mrf.mxu2 }
 0x312   : > { %v1054_v5 = vmax.f32 %v986_v1, 0.0  ;;  %v1324_v6 = vadd.f32 %v3038_v13, %v1323_v2 }
 0x313   : > { %v1661_v7 = vpop.f32.mrf.mxu3 }
 0x314   : > { %v1094_v62 = vpack.c.bf16 %v1054_v5, %v1053_v3  ;;  %v1419_v34 = vmax.f32 %v1324_v6, 0.0  ;;  %v1662_v9 = vadd.f32 %v2909_v58, %v1661_v7 }
 0x316   : > { %v1468_v11 = vpack.c.bf16 %v1419_v34, %v1418_v8  ;;  %v1784_v40 = vmax.f32 %v1662_v9, 0.0  ;;  %2319 = vmatmul.msk.bf16.gmra.mxu2 %vm344_vm0, %v1094_v62 }
 0x317   : > { %v988_v16 = vpop.f32.mrf.mxu1 }
 0x318   : > { %2355 = vmatmul.msk.bf16.gmra.mxu3 %vm344_vm0, %v1468_v11  ;;  %v3073_v17 = vpack.c.bf16 %v1784_v40, %v1783_v10  ;;  %v989_v46 = vadd.f32 %v2952_v18, %v988_v16 }
 0x319   : > { %v1326_v20 = vpop.f32.mrf.mxu2 }
 0x31a   : > { %v1327_v23 = vadd.f32 %v3038_v13, %v1326_v20  ;;  %v1055_v27 = vmax.f32 %v989_v46, 0.0 }
 0x31b   : > { %v1664_v21 = vpop.f32.mrf.mxu3 }
 0x31c   : > { %v1420_v31 = vmax.f32 %v1327_v23, 0.0  ;;  %v1665_v6 = vadd.f32 %v2909_v58, %v1664_v21 }
 0x31e   : > { %v1785_v40 = vmax.f32 %v1665_v6, 0.0 }
 0x31f   : > { %v990_v22 = vpop.f32.mrf.mxu1 }
 0x320   : > { %v991_v24 = vadd.f32 %v2952_v18, %v990_v22 }
 0x321   : > { %v1328_v26 = vpop.f32.mrf.mxu2 }
 0x322   : > { %v1056_v28 = vmax.f32 %v991_v24, 0.0  ;;  %v1329_v29 = vadd.f32 %v3038_v13, %v1328_v26 }
 0x323   : > { %v1666_v30 = vpop.f32.mrf.mxu3 }
 0x324   : > { %v1095_v32 = vpack.c.bf16 %v1056_v28, %v1055_v27  ;;  %v1421_v35 = vmax.f32 %v1329_v29, 0.0  ;;  %v1667_v4 = vadd.f32 %v2909_v58, %v1666_v30 }
 0x326   : > { %v1469_v25 = vpack.c.bf16 %v1421_v35, %v1420_v31  ;;  %2320 = vmatmul.msk.bf16.gmra.mxu2 %vm344_vm0, %v1095_v32  ;;  %v1786_v62 = vmax.f32 %v1667_v4, 0.0 }
 0x328   : > { %2356 = vmatmul.msk.bf16.gmra.mxu3 %vm344_vm0, %v1469_v25  ;;  %v1837_v24 = vpack.c.bf16 %v1786_v62, %v1785_v40  ;;  %v1903_v25 = vsel %vm344_vm0, %v3073_v17, 0 }
 0x329   : > { %v1331_v36 = vpop.f32.mrf.mxu2 }
 0x32a   : > { %v1332_v33 = vadd.f32 %v3038_v13, %v1331_v36  ;;  %v1906_v28 = vsel %vm344_vm0, %v1837_v24, 0 }
 0x32b   : > { %v1669_v37 = vpop.f32.mrf.mxu3 }
 0x32c   : > { %v1422_v39 = vmax.f32 %v1332_v33, 0.0  ;;  %v1670_v60 = vadd.f32 %v2909_v58, %v1669_v37 }
 0x32e   : > { %v1787_v3 = vmax.f32 %v1670_v60, 0.0  ;;  %v1894_v60 = vsel %vm344_vm0, %v3030_v12, 0 }
 0x331   : > { %v1333_v15 = vpop.f32.mrf.mxu2 }
 0x332   : > { %v1334_v18 = vadd.f32 %v3038_v13, %v1333_v15 }
 0x333   : > { %v1671_v38 = vpop.f32.mrf.mxu3 }
 0x334   : > { %v1423_v41 = vmax.f32 %v1334_v18, 0.0  ;;  %v1672_v55 = vadd.f32 %v2909_v58, %v1671_v38 }
 0x336   : > { %v1470_v42 = vpack.c.bf16 %v1423_v41, %v1422_v39  ;;  %v1788_v0 = vmax.f32 %v1672_v55, 0.0 }
 0x338   : > { %2357 = vmatmul.msk.bf16.gmra.mxu3 %vm344_vm0, %v1470_v42  ;;  %v1838_v5 = vpack.c.bf16 %v1788_v0, %v1787_v3 }
 0x339   : > { %v1336_v43 = vpop.f32.mrf.mxu2 }
 0x33a   : > { %v1337_v45 = vadd.f32 %v3038_v13, %v1336_v43  ;;  %v1909_v10 = vsel %vm344_vm0, %v1838_v5, 0  ;;  %v1900_v43 = vsel %vm344_vm0, %v3063_v19, 0 }
 0x33b   : > { %v1674_v44 = vpop.f32.mrf.mxu3 }
 0x33c   : > { %v1675_v49 = vadd.f32 %v2909_v58, %v1674_v44  ;;  %v1424_v52 = vmax.f32 %v1337_v45, 0.0 }
 0x33e   : > { %v1789_v56 = vmax.f32 %v1675_v49, 0.0 }
 0x341   : > { %v1338_v48 = vpop.f32.mrf.mxu2 }
 0x342   : > { %v1339_v50 = vadd.f32 %v3038_v13, %v1338_v48 }
 0x343   : > { %v1676_v51 = vpop.f32.mrf.mxu3 }
 0x344   : > { %v1425_v53 = vmax.f32 %v1339_v50, 0.0  ;;  %v1677_v54 = vadd.f32 %v2909_v58, %v1676_v51  ;;  %v1897_v50 = vsel %vm344_vm0, %v3049_v14, 0 }
 0x346   : > { %v1471_v57 = vpack.c.bf16 %v1425_v53, %v1424_v52  ;;  %v1790_v59 = vmax.f32 %v1677_v54, 0.0 }
 0x348   : > { %2358 = vmatmul.msk.bf16.gmra.mxu3 %vm344_vm0, %v1471_v57  ;;  %v1839_v61 = vpack.c.bf16 %v1790_v59, %v1789_v56 }
 0x349   : > { %v1341_v63 = vpop.f32.mrf.mxu2 }
 0x34a   : > { %v1912_v1 = vsel %vm344_vm0, %v1839_v61, 0  ;;  %v1342_v7 = vadd.f32 %v3038_v13, %v1341_v63 }
 0x34b   : > { %v1679_v2 = vpop.f32.mrf.mxu3  ;;  %1975 = vmatpush.bf16.xpose.msrb.mxu1 %v1912_v1 }
 0x34c   : > { %v1680_v34 = vadd.f32 %v2909_v58, %v1679_v2  ;;  %v1426_v16 = vmax.f32 %v1342_v7, 0.0  ;;  %v1891_v2 = vsel %vm344_vm0, %v3017_v47, 0 }
 0x34e   : > { %v1791_v22 = vmax.f32 %v1680_v34, 0.0 }
 0x351   : > { %v1343_v8 = vpop.f32.mrf.mxu2 }
 0x352   : > { %v1344_v9 = vadd.f32 %v3038_v13, %v1343_v8 }
 0x353   : > { %v1681_v11 = vpop.f32.mrf.mxu3  ;;  %1976 = vmatpush.bf16.xpose.msrb.mxu1 %v1909_v10 }
 0x354   : > { %v1427_v20 = vmax.f32 %v1344_v9, 0.0  ;;  %v1682_v46 = vadd.f32 %v2909_v58, %v1681_v11 }
 0x356   : > { %v1472_v23 = vpack.c.bf16 %v1427_v20, %v1426_v16  ;;  %v1792_v21 = vmax.f32 %v1682_v46, 0.0 }
 0x358   : > { %2359 = vmatmul.msk.bf16.gmra.mxu3 %vm344_vm0, %v1472_v23  ;;  %v3100_v26 = vpack.c.bf16 %v1792_v21, %v1791_v22 }
 0x359   : > { %v1346_v27 = vpop.f32.mrf.mxu2 }
 0x35a   : > { %v1347_v30 = vadd.f32 %v3038_v13, %v1346_v27 }
 0x35b   : > { %v1684_v29 = vpop.f32.mrf.mxu3  ;;  %1977 = vmatpush.bf16.xpose.msrb.mxu1 %v1906_v28 }
 0x35c   : > { %v1685_v32 = vadd.f32 %v2909_v58, %v1684_v29  ;;  %v1428_v37 = vmax.f32 %v1347_v30, 0.0 }
 0x35e   : > { %v1793_v18 = vmax.f32 %v1685_v32, 0.0 }
 0x361   : > { %v1348_v31 = vpop.f32.mrf.mxu2 }
 0x362   : > { %v1349_v35 = vadd.f32 %v3038_v13, %v1348_v31 }
 0x363   : > { %v1686_v36 = vpop.f32.mrf.mxu3  ;;  %1978 = vmatpush.bf16.xpose.msrb.mxu1 %v1903_v25 }
 0x364   : > { %v1429_v33 = vmax.f32 %v1349_v35, 0.0  ;;  %v1687_v15 = vadd.f32 %v2909_v58, %v1686_v36 }
 0x366   : > { %v1473_v38 = vpack.c.bf16 %v1429_v33, %v1428_v37  ;;  %v1794_v39 = vmax.f32 %v1687_v15, 0.0 }
 0x368   : > { %2360 = vmatmul.msk.bf16.gmra.mxu3 %vm344_vm0, %v1473_v38  ;;  %v3110_v41 = vpack.c.bf16 %v1794_v39, %v1793_v18 }
 0x369   : > { %v1351_v42 = vpop.f32.mrf.mxu2 }
 0x36a   : > { %v1352_v17 = vadd.f32 %v3038_v13, %v1351_v42 }
 0x36b   : > { %v1689_v44 = vpop.f32.mrf.mxu3  ;;  %1979 = vmatpush.bf16.xpose.msrb.mxu1 %v1900_v43 }
 0x36c   : > { %v1690_v48 = vadd.f32 %v2909_v58, %v1689_v44  ;;  %v1430_v52 = vmax.f32 %v1352_v17, 0.0  ;;  %v3147_v44 = vld [vmem:[%s3271_s2 + $0x3] ss:$0 sm:$0xff] }
 0x36e   : > { %v1795_v55 = vmax.f32 %v1690_v48, 0.0 }
 0x371   : > { %v1353_v45 = vpop.f32.mrf.mxu2 }
 0x372   : > { %v1354_v49 = vadd.f32 %v3038_v13, %v1353_v45 }
 0x373   : > { %v1691_v51 = vpop.f32.mrf.mxu3  ;;  %1980 = vmatpush.bf16.xpose.msrb.mxu1 %v1897_v50 }
 0x374   : > { %v1431_v53 = vmax.f32 %v1354_v49, 0.0  ;;  %v1692_v54 = vadd.f32 %v2909_v58, %v1691_v51 }
 0x376   : > { %v1474_v19 = vpack.c.bf16 %v1431_v53, %v1430_v52  ;;  %v1796_v56 = vmax.f32 %v1692_v54, 0.0 }
 0x378   : > { %2361 = vmatmul.msk.bf16.gmra.mxu3 %vm344_vm0, %v1474_v19  ;;  %v3121_v57 = vpack.c.bf16 %v1796_v56, %v1795_v55 }
 0x379   : > { %v1356_v59 = vpop.f32.mrf.mxu2 }
 0x37a   : > { %v1357_v14 = vadd.f32 %v3038_v13, %v1356_v59 }
 0x37b   : > { %v1694_v61 = vpop.f32.mrf.mxu3  ;;  %1981 = vmatpush.bf16.xpose.msrb.mxu1 %v1894_v60 }
 0x37c   : > { %v1695_v0 = vadd.f32 %v2909_v58, %v1694_v61  ;;  %v1432_v4 = vmax.f32 %v1357_v14, 0.0 }
 0x37e   : > { %v1797_v7 = vmax.f32 %v1695_v0, 0.0 }
 0x381   : > { %v1358_v63 = vpop.f32.mrf.mxu2 }
 0x382   : > { %v1359_v1 = vadd.f32 %v3038_v13, %v1358_v63 }
 0x383   : > { %v1696_v3 = vpop.f32.mrf.mxu3  ;;  %1982 = vmatpush.bf16.xpose.msrb.mxu1 %v1891_v2 }
 0x384   : > { %v1433_v5 = vmax.f32 %v1359_v1, 0.0  ;;  %v1697_v6 = vadd.f32 %v2909_v58, %v1696_v3 }
 0x386   : > { %v1475_v12 = vpack.c.bf16 %v1433_v5, %v1432_v4  ;;  %v1798_v8 = vmax.f32 %v1697_v6, 0.0 }
 0x388   : > { %2362 = vmatmul.msk.bf16.gmra.mxu3 %vm344_vm0, %v1475_v12  ;;  %v3132_v62 = vpack.c.bf16 %v1798_v8, %v1797_v7 }
 0x389   : > { %v1361_v34 = vpop.f32.mrf.mxu2 }
 0x38a   : > { %v1362_v10 = vadd.f32 %v3038_v13, %v1361_v34 }
 0x38b   : > { %v1699_v9 = vpop.f32.mrf.mxu3 }
 0x38c   : > { %v1434_v16 = vmax.f32 %v1362_v10, 0.0  ;;  %v1700_v4 = vadd.f32 %v3147_v44, %v1699_v9 }
 0x38e   : > { %v1799_v8 = vmax.f32 %v1700_v4, 0.0  ;;  %v1823_v4 = vld [vmem:[%s3272_s3] sm:$0x1] }
 0x38f   : > { %2367 = vmatmul.msk.bf16.vlgmr.msrb.gmra.mxu1 %vm344_vm0, %v1823_v4  ;;  %2366 = vmatmul.msk.bf16.vlgmr.msrb.gmra.mxu0 %vm344_vm0, %v1823_v4 }
 0x391   : > { %v1363_v11 = vpop.f32.mrf.mxu2 }
 0x392   : > { %v1364_v47 = vadd.f32 %v3038_v13, %v1363_v11 }
 0x393   : > { %v1701_v40 = vpop.f32.mrf.mxu3 }
 0x394   : > { %v1435_v20 = vmax.f32 %v1364_v47, 0.0  ;;  %v1702_v0 = vadd.f32 %v3147_v44, %v1701_v40 }
 0x396   : > { %v1476_v46 = vpack.c.bf16 %v1435_v20, %v1434_v16  ;;  %v1800_v6 = vmax.f32 %v1702_v0, 0.0 }
 0x398   : > { %2363 = vmatmul.msk.bf16.gmra.mxu3 %vm344_vm0, %v1476_v46  ;;  %v1844_v34 = vpack.c.bf16 %v1800_v6, %v1799_v8  ;;  %v1924_v46 = vsel %vm344_vm0, %v3132_v62, 0  ;;  %v2515_v6 = vmov 0  }
 0x399   : > { %v1366_v22 = vpop.f32.mrf.mxu2  ;;  %2426 = vset.pattern.permute.xlu0 %v2515_v6 }
 0x39a   : > { %v1367_v21 = vadd.f32 %v3038_v13, %v1366_v22  ;;  %v1927_v11 = vsel %vm344_vm0, %v1844_v34, 0 }
 0x39b   : > { %v1704_v23 = vpop.f32.mrf.mxu3 }
 0x39c   : > { %v1436_v29 = vmax.f32 %v1367_v21, 0.0  ;;  %v1705_v19 = vadd.f32 %v3147_v44, %v1704_v23  ;;  %v1921_v21 = vsel %vm344_vm0, %v3121_v57, 0 }
 0x39e   : > { %v1801_v14 = vmax.f32 %v1705_v19, 0.0 }
 0x3a1   : > { %v1368_v24 = vpop.f32.mrf.mxu2 }
 0x3a2   : > { %v1369_v27 = vadd.f32 %v3038_v13, %v1368_v24 }
 0x3a3   : > { %v1706_v28 = vpop.f32.mrf.mxu3 }
 0x3a4   : > { %v1437_v30 = vmax.f32 %v1369_v27, 0.0  ;;  %v1707_v54 = vadd.f32 %v3147_v44, %v1706_v28 }
 0x3a6   : > { %v1477_v31 = vpack.c.bf16 %v1437_v30, %v1436_v29  ;;  %v1802_v56 = vmax.f32 %v1707_v54, 0.0 }
 0x3a8   : > { %2364 = vmatmul.msk.bf16.gmra.mxu3 %vm344_vm0, %v1477_v31  ;;  %v1845_v3 = vpack.c.bf16 %v1802_v56, %v1801_v14  ;;  %v1918_v31 = vsel %vm344_vm0, %v3110_v41, 0 }
 0x3a9   : > { %v1371_v32 = vpop.f32.mrf.mxu2 }
 0x3aa   : > { %v1372_v25 = vadd.f32 %v3038_v13, %v1371_v32  ;;  %v1930_v7 = vsel %vm344_vm0, %v1845_v3, 0 }
 0x3ab   : > { %v1709_v35 = vpop.f32.mrf.mxu3 }
 0x3ac   : > { %v1438_v15 = vmax.f32 %v1372_v25, 0.0  ;;  %v1710_v49 = vadd.f32 %v3147_v44, %v1709_v35  ;;  %v1915_v35 = vsel %vm344_vm0, %v3100_v26, 0 }
 0x3b1   : > { %v1373_v36 = vpop.f32.mrf.mxu2 }
 0x3b2   : > { %v1374_v37 = vadd.f32 %v3038_v13, %v1373_v36 }
 0x3b3   : > { %v1711_v33 = vpop.f32.mrf.mxu3 }
 0x3b4   : > { %v1439_v18 = vmax.f32 %v1374_v37, 0.0  ;;  %v1712_v45 = vadd.f32 %v3147_v44, %v1711_v33 }
 0x3b6   : > { %v1478_v38 = vpack.c.bf16 %v1439_v18, %v1438_v15  ;;  %v1804_v51 = vmax.f32 %v1712_v45, 0.0 }
 0x3b8   : > { %2365 = vmatmul.msk.bf16.gmra.mxu3 %vm344_vm0, %v1478_v38 }
 0x3bb   : > { %v1714_v39 = vpop.f32.mrf.mxu3 }
 0x3bc   : > { %v1715_v42 = vadd.f32 %v2909_v58, %v1714_v39  ;;  %v1803_v58 = vmax.f32 %v1710_v49, 0.0 }
 0x3be   : > { %v1805_v13 = vmax.f32 %v1715_v42, 0.0  ;;  %v1846_v55 = vpack.c.bf16 %v1804_v51, %v1803_v58 }
 0x3c0   : > { %v1933_v60 = vsel %vm344_vm0, %v1846_v55, 0 }
 0x3c3   : > { %v1716_v43 = vpop.f32.mrf.mxu3 }
 0x3c4   : > { %v1717_v17 = vadd.f32 %v3147_v44, %v1716_v43 }
 0x3c6   : > { %v1806_v48 = vmax.f32 %v1717_v17, 0.0 }
 0x3c8   : > { %v1847_v50 = vpack.c.bf16 %v1806_v48, %v1805_v13 }
 0x3ca   : > { %v1936_v52 = vsel %vm344_vm0, %v1847_v50, 0 }
 0x3cb   : > { %v1719_v53 = vpop.f32.mrf.mxu3  ;;  %1988 = vmatpush.bf16.xpose.msrb.mxu2 %v1936_v52 }
 0x3cc   : > { %v1720_v59 = vadd.f32 %v3147_v44, %v1719_v53 }
 0x3ce   : > { %v1807_v1 = vmax.f32 %v1720_v59, 0.0 }
 0x3d3   : > { %v1721_v61 = vpop.f32.mrf.mxu3  ;;  %1989 = vmatpush.bf16.xpose.msrb.mxu2 %v1933_v60 }
 0x3d4   : > { %v1722_v63 = vadd.f32 %v3147_v44, %v1721_v61 }
 0x3d6   : > { %v1808_v2 = vmax.f32 %v1722_v63, 0.0 }
 0x3d8   : > { %v3160_v5 = vpack.c.bf16 %v1808_v2, %v1807_v1 }
 0x3db   : > { %v1724_v12 = vpop.f32.mrf.mxu3  ;;  %1990 = vmatpush.bf16.xpose.msrb.mxu2 %v1930_v7  ;;  %v1856_v7 = vld [vmem:[#allocation2] sm:$0x1] }
 0x3dc   : > { %v1725_v10 = vadd.f32 %v3147_v44, %v1724_v12  ;;  %1859 = vperm.xlu0 %2426, %v1856_v7  }
 0x3de   : > { %v1809_v16 = vmax.f32 %v1725_v10, 0.0  ;;  %v1939_v10 = vsel %vm344_vm0, %v3160_v5, 0 }
 0x3e3   : > { %v1726_v47 = vpop.f32.mrf.mxu3  ;;  %1991 = vmatpush.bf16.xpose.msrb.mxu2 %v1927_v11 }
 0x3e4   : > { %v1727_v40 = vadd.f32 %v3147_v44, %v1726_v47 }
 0x3e6   : > { %v1810_v20 = vmax.f32 %v1727_v40, 0.0 }
 0x3e8   : > { %v3166_v9 = vpack.c.bf16 %v1810_v20, %v1809_v16 }
 0x3ea   : > { %v1942_v34 = vsel %vm344_vm0, %v3166_v9, 0 }
 0x3eb   : > { %v1729_v22 = vpop.f32.mrf.mxu3  ;;  %1992 = vmatpush.bf16.xpose.msrb.mxu2 %v1924_v46 }
 0x3ec   : > { %v1730_v23 = vadd.f32 %v3147_v44, %v1729_v22 }
 0x3ee   : > { %v1811_v28 = vmax.f32 %v1730_v23, 0.0 }
 0x3f3   : > { %v1731_v24 = vpop.f32.mrf.mxu3  ;;  %1993 = vmatpush.bf16.xpose.msrb.mxu2 %v1921_v21 }
 0x3f4   : > { %v1732_v27 = vadd.f32 %v3147_v44, %v1731_v24 }
 0x3f6   : > { %v1812_v29 = vmax.f32 %v1732_v27, 0.0 }
 0x3f8   : > { %v1850_v30 = vpack.c.bf16 %v1812_v29, %v1811_v28 }
 0x3fa   : > { %v1945_v8 = vsel %vm344_vm0, %v1850_v30, 0 }
 0x3fb   : > { %v1734_v32 = vpop.f32.mrf.mxu3  ;;  %1994 = vmatpush.bf16.xpose.msrb.mxu2 %v1918_v31 }
 0x3fc   : > { %v1735_v62 = vadd.f32 %v3147_v44, %v1734_v32 }
 0x3fe   : > { %v1813_v36 = vmax.f32 %v1735_v62, 0.0 }
 0x403   : > { %v1736_v25 = vpop.f32.mrf.mxu3  ;;  %1995 = vmatpush.bf16.xpose.msrb.mxu2 %v1915_v35 }
 0x404   : > { %v1737_v57 = vadd.f32 %v3147_v44, %v1736_v25 }
 0x406   : > { %v1814_v37 = vmax.f32 %v1737_v57, 0.0 }
 0x408   : > { %v1851_v33 = vpack.c.bf16 %v1814_v37, %v1813_v36 }
 0x40a   : > { %2368 = vmatmul.msk.bf16.vlgmr.msrb.gmra.mxu2 %vm344_vm0, %v1823_v4  ;;  %v1948_v12 = vsel %vm344_vm0, %v1851_v33, 0 }
 0x40b   : > { %v1739_v15 = vpop.f32.mrf.mxu3 }
 0x40c   : > { %v1740_v18 = vadd.f32 %v3147_v44, %v1739_v15  ;;  %v1984_v11 = vpop.f32.mrf.mxu1  ;;  %v1971_v40 = vpop.f32.mrf.mxu0 }
 0x40e   : > { %v1815_v39 = vmax.f32 %v1740_v18, 0.0 }
 0x413   : > { %v1741_v38 = vpop.f32.mrf.mxu3 }
 0x414   : > { %v1742_v41 = vadd.f32 %v3147_v44, %v1741_v38  ;;  %v1986_v16 = vpop.f32.mrf.mxu1  ;;  %v1973_v46 = vpop.f32.mrf.mxu0 }
 0x416   : > { %v1816_v42 = vmax.f32 %v1742_v41, 0.0 }
 0x418   : > { %v1852_v43 = vpack.c.bf16 %v1816_v42, %v1815_v39 }
 0x41b   : > { %v1744_v17 = vpop.f32.mrf.mxu3 }
 0x41c   : > { %v1745_v14 = vadd.f32 %v3147_v44, %v1744_v17 }
 0x41e   : > { %v1817_v1 = vmax.f32 %v1745_v14, 0.0 }
 0x423   : > { %v1746_v45 = vpop.f32.mrf.mxu3 }
 0x424   : > { %v1747_v60 = vadd.f32 %v3147_v44, %v1746_v45 }
 0x426   : > { %v1818_v63 = vmax.f32 %v1747_v60, 0.0 }
 0x428   : > { %v1853_v2 = vpack.c.bf16 %v1818_v63, %v1817_v1 }
 0x42a   : > { %v1954_v3 = vsel %vm344_vm0, %v1853_v2, 0 }
 0x42b   : > { %v1749_v13 = vpop.f32.mrf.mxu3 }
 0x42c   : > { %v1750_v54 = vadd.f32 %v3147_v44, %v1749_v13 }
 0x42e   : > { %v1819_v59 = vmax.f32 %v1750_v54, 0.0 }
 0x433   : > { %v1751_v26 = vpop.f32.mrf.mxu3 }
 0x434   : > { %v1752_v52 = vadd.f32 %v3147_v44, %v1751_v26 }
 0x436   : > { %v1820_v19 = vmax.f32 %v1752_v52, 0.0 }
 0x438   : > { %v1854_v61 = vpack.c.bf16 %v1820_v19, %v1819_v59 }
 0x43a   : > { %v1957_v0 = vsel %vm344_vm0, %v1854_v61, 0 }
 0x43b   : > { %v1754_v48 = vpop.f32.mrf.mxu3 }
 0x43c   : > { %v1755_v49 = vadd.f32 %v3147_v44, %v1754_v48 }
 0x43e   : > { %v1821_v53 = vmax.f32 %v1755_v49, 0.0 }
 0x443   : > { %v1756_v50 = vpop.f32.mrf.mxu3 }
 0x444   : > { %v1757_v51 = vadd.f32 %v3147_v44, %v1756_v50  ;;  %v1951_v44 = vsel %vm344_vm0, %v1852_v43, 0 }
 0x446   : > { %v1822_v58 = vmax.f32 %v1757_v51, 0.0 }
 0x448   : > { %v1855_v55 = vpack.c.bf16 %v1822_v58, %v1821_v53 }
 0x44a   : > { %v1960_v56 = vsel %vm344_vm0, %v1855_v55, 0 }
 0x44b   : > { %2001 = vmatpush.bf16.xpose.msrb.mxu3 %v1960_v56 }
 0x44e   : > { %v1860_v22 = vpop.permute.xlu0 %1859 }
 0x44f   : > { %v1862_v23 = vperm.slane %v1860_v22, 0 }
 0x451   : > { %v1985_v21 = vadd.f32 %v1984_v11, %v1862_v23  ;;  %v1972_v28 = vadd.f32 %v1971_v40, %v1862_v23  ;;  %v2104_v40 = vlaneseq }
 0x453   : > { %2002 = vmatpush.bf16.xpose.msrb.mxu3 %v1957_v0  ;;  %v2371_v27 = vmul.f32 -1.442695, %v1985_v21  ;;  %v2370_v29 = vmul.f32 -1.442695, %v1972_v28 }
 0x455   : > { %2431 = vpow2.f32 %v2371_v27 }
 0x45b   : > { %2003 = vmatpush.bf16.xpose.msrb.mxu3 %v1954_v3  ;;  %v2432_v5 = vpop.eup %2431 }
 0x45c   : > { %v2027_v31 = vadd.f32 1.0, %v2432_v5 }
 0x45e   : > { %vm2050_vm1 = vweird.f32 %v2027_v31  ;;  %v2056_v49 = vand.u32 2147483648, %v2027_v31  ;;  %v2054_v52 = vand.u32 2147483647, %v2027_v31 }
 0x460   : > { %v2057_v60 = vor.u32 1.1754944e-38, %v2056_v49  ;;  %vm2055_vm9 = vcmp.eq.f32.partialorder %v2054_v52, 8.507059e+37 }
 0x463   : > { %2004 = vmatpush.bf16.xpose.msrb.mxu3 %v1951_v44 }
 0x46b   : > { %2005 = vmatpush.bf16.xpose.msrb.mxu3 %v1948_v12 }
 0x473   : > { %2006 = vmatpush.bf16.xpose.msrb.mxu3 %v1945_v8 }
 0x47b   : > { %2007 = vmatpush.bf16.xpose.msrb.mxu3 %v1942_v34 }
 0x483   : > { %2008 = vmatpush.bf16.xpose.msrb.mxu3 %v1939_v10 }
 0x48a   : > { %2369 = vmatmul.msk.bf16.vlgmr.msrb.gmra.mxu3 %vm344_vm0, %v1823_v4 }
 0x48d   : > { %v1997_v47 = vpop.f32.mrf.mxu2 }
 0x48e   : > { %v1998_v24 = vadd.f32 %v1997_v47, %v1862_v23 }
 0x490   : > { %v2372_v9 = vmul.f32 -1.442695, %v1998_v24 }
 0x492   : > { %2433 = vpow2.f32 %v2372_v9 }
 0x493   : > { %2435 = vpow2.f32 %v2370_v29 }
 0x494   : > { %2437 = vrcp.f32 %v2027_v31 }
 0x495   : > { %v1999_v20 = vpop.f32.mrf.mxu2 }
 0x498   : > { %v2434_v30 = vpop.eup %2433 }
 0x499   : > { %v2436_v32 = vpop.eup %2435  ;;  %v2028_v62 = vadd.f32 1.0, %v2434_v30 }
 0x49a   : > { %v2026_v35 = vadd.f32 1.0, %v2436_v32  ;;  %v2438_v37 = vpop.eup %2437 }
 0x49b   : > { %2439 = vrcp.f32 %v2028_v62  ;;  %v2046_v15 = vmul.f32 %v2438_v37, %v2027_v31  ;;  %vm2051_vm2 = vweird.f32 %v2438_v37  ;;  %vm2065_vm3 = vweird.f32 %v2028_v62 }
 0x49c   : > { %2441 = vrcp.f32 %v2026_v35  ;;  %vm3209_vm5 = vmor %vm2050_vm1, %vm2051_vm2  ;;  %v2071_v54 = vand.u32 2147483648, %v2028_v62  ;;  %vm2035_vm7 = vweird.f32 %v2026_v35  ;;  %v2069_v59 = vand.u32 2147483647, %v2028_v62 }
 0x49d   : > { %v2047_v42 = vsub.f32 1.0, %v2046_v15  ;;  %v2039_v61 = vand.u32 2147483647, %v2026_v35  ;;  %v2041_v14 = vand.u32 2147483648, %v2026_v35  ;;  %vm2097_vm1 = vcmask 1040384  }
 0x49e   : > { %v2072_v2 = vor.u32 1.1754944e-38, %v2071_v54  ;;  %vm2070_vm12 = vcmp.eq.f32.partialorder %v2069_v59, 8.507059e+37  ;;  %vm2099_vm2 = vcmask 1042434  }
 0x49f   : > { %v2048_v13 = vmul.f32 %v2438_v37, %v2047_v42  ;;  %v2042_v12 = vor.u32 1.1754944e-38, %v2041_v14  ;;  %vm2040_vm14 = vcmp.eq.f32.partialorder %v2039_v61, 8.507059e+37 }
 0x4a1   : > { %v2440_v33 = vpop.eup %2439  ;;  %v2049_v51 = vadd.f32 %v2438_v37, %v2048_v13 }
 0x4a2   : > { %v3205_v18 = vpop.eup %2441  ;;  %v2061_v38 = vmul.f32 %v2440_v33, %v2028_v62  ;;  %vm2066_vm4 = vweird.f32 %v2440_v33 }
 0x4a3   : > { %v2031_v43 = vmul.f32 %v3205_v18, %v2026_v35  ;;  %vm3213_vm6 = vmor %vm2065_vm3, %vm2066_vm4  ;;  %vm2036_vm8 = vweird.f32 %v3205_v18  ;;  %v2053_v1 = vsel %vm3209_vm5, %v2438_v37, %v2049_v51  ;;  %vm2101_vm3 = vcmask 1041408  }
 0x4a4   : > { %v2062_v17 = vsub.f32 1.0, %v2061_v38  ;;  %vm3226_vm10 = vmor %vm2035_vm7, %vm2036_vm8  ;;  %v2058_v8 = vsel %vm2055_vm9, %v2057_v60, %v2053_v1  ;;  %vm2106_vm4 = vcmp.lt.s32.totalorder %v2104_v40, 512 }
 0x4a5   : > { %v2032_v26 = vsub.f32 1.0, %v2031_v43  ;;  %v2094_v20 = vrot.slane %v2058_v8, 7 }
 0x4a6   : > { %v2063_v48 = vmul.f32 %v2440_v33, %v2062_v17 }
 0x4a7   : > { %v2033_v50 = vmul.f32 %v3205_v18, %v2032_v26 }
 0x4a8   : > { %v2064_v55 = vadd.f32 %v2440_v33, %v2063_v48 }
 0x4a9   : > { %v2034_v0 = vadd.f32 %v3205_v18, %v2033_v50 }
 0x4aa   : > { %v2068_v44 = vsel %vm3213_vm6, %v2440_v33, %v2064_v55 }
 0x4ab   : > { %v2038_v34 = vsel %vm3226_vm10, %v3205_v18, %v2034_v0  ;;  %v2073_v47 = vsel %vm2070_vm12, %v2072_v2, %v2068_v44 }
 0x4ac   : > { %v2043_v46 = vsel %vm2040_vm14, %v2042_v12, %v2038_v34 }
 0x4ad   : > { %v2098_v24 = vsel %vm2097_vm1, %v2043_v46, %v2094_v20 }
 0x50d   : > { %v2010_v25 = vpop.f32.mrf.mxu3 }
 0x50e   : > { %v2011_v57 = vadd.f32 %v2010_v25, %v1862_v23  ;;  %v2095_v23 = vrot.slane %v2073_v47, 6 }
 0x510   : > { %v2373_v36 = vmul.f32 -1.442695, %v2011_v57 }
 0x512   : > { %2443 = vpow2.f32 %v2373_v36 }
 0x515   : > { %v2012_v41 = vpop.f32.mrf.mxu3 }
 0x518   : > { %v2444_v39 = vpop.eup %2443 }
 0x519   : > { %v2029_v45 = vadd.f32 1.0, %v2444_v39 }
 0x51b   : > { %2445 = vrcp.f32 %v2029_v45  ;;  %v2086_v3 = vand.u32 2147483648, %v2029_v45  ;;  %v2084_v7 = vand.u32 2147483647, %v2029_v45  ;;  %vm2080_vm13 = vweird.f32 %v2029_v45 }
 0x51d   : > { %v2087_v11 = vor.u32 1.1754944e-38, %v2086_v3  ;;  %vm2085_vm0 = vcmp.eq.f32.partialorder %v2084_v7, 8.507059e+37 }
 0x521   : > { %v2446_v53 = vpop.eup %2445 }
 0x522   : > { %v2076_v56 = vmul.f32 %v2446_v53, %v2029_v45  ;;  %vm2081_vm11 = vweird.f32 %v2446_v53 }
 0x523   : > { %vm2082_vm15 = vmor %vm2080_vm13, %vm2081_vm11 }
 0x524   : > { %v2077_v63 = vsub.f32 1.0, %v2076_v56 }
 0x526   : > { %v2078_v6 = vmul.f32 %v2446_v53, %v2077_v63 }
 0x528   : > { %v2079_v10 = vadd.f32 %v2446_v53, %v2078_v6 }
 0x52a   : > { %v2083_v16 = vsel %vm2082_vm15, %v2446_v53, %v2079_v10 }
 0x52b   : > { %v2088_v22 = vsel %vm2085_vm0, %v2087_v11, %v2083_v16 }
 0x52c   : > { %v2096_v21 = vrot.slane %v2088_v22, 5 }
 0x52e   : > { %v2100_v27 = vsel %vm2099_vm2, %v2095_v23, %v2096_v21 }
 0x52f   : > { %v2102_v28 = vsel %vm2101_vm3, %v2098_v24, %v2100_v27 }
 0x530   : > { %2108 = vst.msk [vmem:[%s220_s4] sm:$0xf] %vm2106_vm4, %v2102_v28 }
 0x531   : > { %2478 = shalt.err (!%p2475_p3)
}
 0x532   : > { %2386 = dma.vmem_to_hbm [thread:$0]  (%p2587_p5), %s2123_s17, 64, %s2125_s18, %s2110_s19  }
 0x533 PF: > { %p2392_p4 = scmp.ge.s32.totalorder %s2513_s23, 2  ;;  %s2136_s10 = sand.u32 1, %s2501_s20  }
 0x534   : > { %s2137_s11 = scalar_lea.sflag [#allocation4], %s2136_s10 }
 0x535   : > { %p2389_p7 = pnand %p2392_p4, %p2591_p6 }
 0x537   : > { %p2390_p8 = pneg %p2389_p7 }
 0x539   : > { %2496 = dma.done.wait (%p2390_p8), %s2137_s11, 64  }
 0x53a   : > { %2498 = vsyncadd (%p2390_p8), %s2137_s11, 4294967232  ;;  %p17_p9 = scmp.ge.s32.totalorder %s2574_s25, 4   ;;  %s3283_s20 = smov %s2505_s21 }
 0x53b   : > { %s3284_s21 = smov %s2509_s22  ;;  %s3285_s22 = smov %s2585_s28 }
 0x53c   : > { %s3286_s23 = smov %s2574_s25  ;;  %19 = sbr.rel (!%p17_p9) target bundleno = 6 (0x6), region = 81 }
 0x541   :  { %2143 = vsyncpa [#allocation4], 1 }
 0x542   :  { %2145 = vsyncpa [#allocation4 + $0x1], 1 }

</bundles_post_ra>
